<compile_context>
chip_gen: v7x
topology: tpu7x:2x2x1
jax: 0.10.0
libtpu: 0.0.40
codegen_flags: <defaults>
</compile_context>

<pallas_src>
import jax
import jax.numpy as jnp
from jax.experimental import pallas as pl
from jax.experimental.pallas import tpu as pltpu


def _build_kernel(H, W, K, F):
    pad = K // 2
    N = H * W

    def kernel(x_ref, w_ref, o_ref, mpad_ref, xpad_ref):
        # x_ref: (B, C, N) f32, lane axis = N (row-major flattened H*W)
        # w_ref: (2*K*K,) f32 in SMEM, order [c_in, kh, kw]  (c_in 0 = mean, 1 = max)
        # mpad_ref / xpad_ref: (B, N + 2F) f32 VMEM scratch — flat zero-padded pooled maps
        x = x_ref[...]                                        # (B, C, N)
        B = x.shape[0]

        # Channel pooling: cat([mean(x, 1), max(x, 1)[0]], 1), flattened over space.
        mean = jnp.mean(x, axis=1)                            # (B, N)
        mx = jnp.max(x, axis=1)                               # (B, N)

        # Flat zero-padded feature maps.  Rows stay contiguous, so a (kh, kw) conv tap is the
        # flat offset (kh - pad) * W + (kw - pad); out-of-range H reads hit the real zero pad,
        # out-of-range W reads are masked per-kw below.
        mpad_ref[...] = jnp.zeros_like(mpad_ref)
        xpad_ref[...] = jnp.zeros_like(xpad_ref)
        mpad_ref[:, F:F + N] = mean                           # 128-aligned lane store
        xpad_ref[:, F:F + N] = mx

        # Row-edge validity masks, one per kw (depend only on the column index).
        col = jax.lax.broadcasted_iota(jnp.int32, (1, N), 1) % W
        masks = []
        for kw in range(K):
            c_src = col + (kw - pad)
            masks.append((c_src >= 0) & (c_src < W))          # (1, N) bool

        pads = (mpad_ref, xpad_ref)
        acc = jnp.zeros((B, N), jnp.float32)
        for kw in range(K):
            part = jnp.zeros((B, N), jnp.float32)
            for c in range(2):
                for kh in range(K):
                    start = F + (kh - pad) * W + (kw - pad)   # static flat offset
                    wk = w_ref[c * K * K + kh * K + kw]       # SMEM scalar
                    part = part + wk * pads[c][:, start:start + N]
            acc = acc + jnp.where(masks[kw], part, 0.0)       # mask applied once per kw

        attn = jax.nn.sigmoid(acc)                            # EUP
        o_ref[...] = x * attn[:, None, :]                     # broadcast over C, lane-dense

    return kernel


def spatial_attention(x_nchw, w_conv):
    """x_nchw: (B, C, H, W) f32;  w_conv: (1, 2, K, K) f32 (Conv2d(2,1,K,pad=K//2,bias=False))."""
    B, C, H, W = x_nchw.shape
    K = int(w_conv.shape[-1])
    pad = K // 2
    N = H * W
    # Flat zero-pad length: must cover pad*W + pad taps on each side; rounded up to a multiple
    # of 128 so the pooled-map store stays lane-aligned.
    F = ((max(pad * W + pad, 1) + 127) // 128) * 128
    L = N + 2 * F

    x = x_nchw.reshape(B, C, N).astype(jnp.float32)           # free trailing-dim merge
    w_flat = jnp.asarray(w_conv, jnp.float32).reshape(-1)     # (2*K*K,)

    # TODO(synk): for large H*W, tile the N axis (grid over spatial blocks with halo reads)
    # instead of holding the whole (B, C, N) block in VMEM.
    out = pl.pallas_call(
        _build_kernel(H, W, K, F),
        out_shape=jax.ShapeDtypeStruct((B, C, N), jnp.float32),
        grid=(1,),
        in_specs=[
            pl.BlockSpec((B, C, N), lambda i: (0, 0, 0)),          # whole x, lane axis = N
            pl.BlockSpec(memory_space=pltpu.MemorySpace.SMEM),     # conv weights as scalars
        ],
        out_specs=pl.BlockSpec((B, C, N), lambda i: (0, 0, 0)),
        scratch_shapes=[
            pltpu.VMEM((B, L), jnp.float32),                       # padded mean map
            pltpu.VMEM((B, L), jnp.float32),                       # padded max map
        ],
        compiler_params=pltpu.CompilerParams(dimension_semantics=("arbitrary",)),
    )(x, w_flat)

    return out.reshape(B, C, H, W)


def reference_forward(x, w_conv):
    """Pure-JAX reference of the PyTorch module's forward, for correctness checking."""
    avg = jnp.mean(x, axis=1, keepdims=True)
    mx = jnp.max(x, axis=1, keepdims=True)
    feat = jnp.concatenate([avg, mx], axis=1)                  # (B, 2, H, W)
    pad = w_conv.shape[-1] // 2
    conv = jax.lax.conv_general_dilated(
        feat, w_conv, window_strides=(1, 1),
        padding=((pad, pad), (pad, pad)),
        dimension_numbers=("NCHW", "OIHW", "NCHW"))            # (B, 1, H, W)
    return x * jax.nn.sigmoid(conv)


if __name__ == "__main__":
    B, C, H, W = 2, 4, 16, 16          # N = H*W = 256 -> lane-dense (2 x 128)
    K = 7                              # SpatialAttention default kernel_size

    key = jax.random.PRNGKey(0)
    kx, kw = jax.random.split(key)
    x = jax.random.normal(kx, (B, C, H, W), jnp.float32)
    w_conv = 0.2 * jax.random.normal(kw, (1, 2, K, K), jnp.float32)   # Conv2d(2,1,7,pad=3,bias=False)

    out = spatial_attention(x, w_conv)
    out = jax.block_until_ready(out)

    ref = reference_forward(x, w_conv)
    assert out.shape == (B, C, H, W)
    assert jnp.allclose(out, ref, atol=1e-4, rtol=1e-4), "mismatch vs reference"

    print("KERNEL_OK")
</pallas_src>

<mosaic_0001>
module attributes {stable_mosaic.version = 11 : i64} {
  func.func @kernel(%arg0: i32, %arg1: memref<2x4x256xf32, #tpu.memory_space<vmem>>, %arg2: memref<98xf32, #tpu.memory_space<smem>>, %arg3: memref<2x4x256xf32, #tpu.memory_space<vmem>>, %arg4: memref<2x512xf32, #tpu.memory_space<vmem>>, %arg5: memref<2x512xf32, #tpu.memory_space<vmem>>) attributes {dimension_semantics = [#tpu.dimension_semantics<arbitrary>], iteration_bounds = array<i64: 1>, scalar_prefetch = 0 : i64, scratch_operands = 2 : i64, tpu.core_type = #tpu.core_type<tc>, window_params = [{pipeline_mode = #tpu.pipeline_mode<synchronous>, transform_indices = @transform_0, window_bounds = array<i64: 2, 4, 256>}, {transform_indices = @transform_1, window_bounds = array<i64: 98>}, {pipeline_mode = #tpu.pipeline_mode<synchronous>, transform_indices = @transform_2, window_bounds = array<i64: 2, 4, 256>}]} {
    %c0 = arith.constant 0 : index
    %c0_0 = arith.constant 0 : index
    %c0_1 = arith.constant 0 : index
    %0 = vector.load %arg1[%c0, %c0_0, %c0_1] : memref<2x4x256xf32, #tpu.memory_space<vmem>>, vector<2x4x256xf32>
    %cst = arith.constant dense<0.000000e+00> : vector<2x256xf32>
    %1 = vector.multi_reduction <add>, %0, %cst [1] : vector<2x4x256xf32> to vector<2x256xf32>
    %cst_2 = arith.constant 4.000000e+00 : f32
    %2 = vector.broadcast %cst_2 : f32 to vector<2x256xf32>
    %3 = arith.divf %1, %2 : vector<2x256xf32>
    %cst_3 = arith.constant dense<0xFF800000> : vector<2x256xf32>
    %4 = vector.multi_reduction <maximumf>, %0, %cst_3 [1] : vector<2x4x256xf32> to vector<2x256xf32>
    %cst_4 = arith.constant 0.000000e+00 : f32
    %5 = vector.broadcast %cst_4 : f32 to vector<2x512xf32>
    %c0_5 = arith.constant 0 : index
    %c0_6 = arith.constant 0 : index
    %6 = vector.load %arg4[%c0_5, %c0_6] : memref<2x512xf32, #tpu.memory_space<vmem>>, vector<2x512xf32>
    tpu.vector_store %arg4[%c0_5, %c0_6], %5 {strides = array<i32>} : memref<2x512xf32, #tpu.memory_space<vmem>>, vector<2x512xf32>,
    %cst_7 = arith.constant 0.000000e+00 : f32
    %7 = vector.broadcast %cst_7 : f32 to vector<2x512xf32>
    %c0_8 = arith.constant 0 : index
    %c0_9 = arith.constant 0 : index
    %8 = vector.load %arg5[%c0_8, %c0_9] : memref<2x512xf32, #tpu.memory_space<vmem>>, vector<2x512xf32>
    tpu.vector_store %arg5[%c0_8, %c0_9], %7 {strides = array<i32>} : memref<2x512xf32, #tpu.memory_space<vmem>>, vector<2x512xf32>,
    %c0_10 = arith.constant 0 : index
    %c128 = arith.constant 128 : index
    %9 = vector.load %arg4[%c0_10, %c128] : memref<2x512xf32, #tpu.memory_space<vmem>>, vector<2x256xf32>
    tpu.vector_store %arg4[%c0_10, %c128], %3 {strides = array<i32>} : memref<2x512xf32, #tpu.memory_space<vmem>>, vector<2x256xf32>,
    %c0_11 = arith.constant 0 : index
    %c128_12 = arith.constant 128 : index
    %10 = vector.load %arg5[%c0_11, %c128_12] : memref<2x512xf32, #tpu.memory_space<vmem>>, vector<2x256xf32>
    tpu.vector_store %arg5[%c0_11, %c128_12], %4 {strides = array<i32>} : memref<2x512xf32, #tpu.memory_space<vmem>>, vector<2x256xf32>,
    %11 = tpu.iota {dimensions = array<i32: 1>} : vector<1x256xi32>
    %c16_i32 = arith.constant 16 : i32
    %c0_i32 = arith.constant 0 : i32
    %12 = arith.cmpi eq, %c16_i32, %c0_i32 : i32
    %c1_i32 = arith.constant 1 : i32
    %13 = arith.select %12, %c1_i32, %c16_i32 : i32
    %14 = vector.broadcast %13 : i32 to vector<1x256xi32>
    %15 = arith.remsi %11, %14 : vector<1x256xi32>
    %c0_i32_13 = arith.constant 0 : i32
    %16 = vector.broadcast %c0_i32_13 : i32 to vector<1x256xi32>
    %17 = arith.cmpi ne, %15, %16 : vector<1x256xi32>
    %c0_i32_14 = arith.constant 0 : i32
    %18 = vector.broadcast %c0_i32_14 : i32 to vector<1x256xi32>
    %19 = arith.cmpi slt, %15, %18 : vector<1x256xi32>
    %c0_i32_15 = arith.constant 0 : i32
    %20 = arith.cmpi slt, %13, %c0_i32_15 : i32
    %21 = vector.broadcast %20 : i1 to vector<1x256xi1>
    %22 = vector.broadcast %21 : vector<1x256xi1> to vector<1x256xi1>
    %23 = arith.xori %19, %22 : vector<1x256xi1>
    %24 = arith.andi %23, %17 : vector<1x256xi1>
    %25 = vector.broadcast %13 : i32 to vector<1x256xi32>
    %26 = arith.addi %15, %25 : vector<1x256xi32>
    %27 = arith.select %24, %26, %15 : vector<1x256xi1>, vector<1x256xi32>
    %c-3_i32 = arith.constant -3 : i32
    %28 = vector.broadcast %c-3_i32 : i32 to vector<1x256xi32>
    %29 = arith.addi %27, %28 : vector<1x256xi32>
    %c0_i32_16 = arith.constant 0 : i32
    %30 = vector.broadcast %c0_i32_16 : i32 to vector<1x256xi32>
    %31 = arith.cmpi sge, %29, %30 : vector<1x256xi32>
    %c16_i32_17 = arith.constant 16 : i32
    %32 = vector.broadcast %c16_i32_17 : i32 to vector<1x256xi32>
    %33 = arith.cmpi slt, %29, %32 : vector<1x256xi32>
    %34 = arith.andi %31, %33 : vector<1x256xi1>
    %c-2_i32 = arith.constant -2 : i32
    %35 = vector.broadcast %c-2_i32 : i32 to vector<1x256xi32>
    %36 = arith.addi %27, %35 : vector<1x256xi32>
    %c0_i32_18 = arith.constant 0 : i32
    %37 = vector.broadcast %c0_i32_18 : i32 to vector<1x256xi32>
    %38 = arith.cmpi sge, %36, %37 : vector<1x256xi32>
    %c16_i32_19 = arith.constant 16 : i32
    %39 = vector.broadcast %c16_i32_19 : i32 to vector<1x256xi32>
    %40 = arith.cmpi slt, %36, %39 : vector<1x256xi32>
    %41 = arith.andi %38, %40 : vector<1x256xi1>
    %c-1_i32 = arith.constant -1 : i32
    %42 = vector.broadcast %c-1_i32 : i32 to vector<1x256xi32>
    %43 = arith.addi %27, %42 : vector<1x256xi32>
    %c0_i32_20 = arith.constant 0 : i32
    %44 = vector.broadcast %c0_i32_20 : i32 to vector<1x256xi32>
    %45 = arith.cmpi sge, %43, %44 : vector<1x256xi32>
    %c16_i32_21 = arith.constant 16 : i32
    %46 = vector.broadcast %c16_i32_21 : i32 to vector<1x256xi32>
    %47 = arith.cmpi slt, %43, %46 : vector<1x256xi32>
    %48 = arith.andi %45, %47 : vector<1x256xi1>
    %c0_i32_22 = arith.constant 0 : i32
    %49 = vector.broadcast %c0_i32_22 : i32 to vector<1x256xi32>
    %50 = arith.addi %27, %49 : vector<1x256xi32>
    %c0_i32_23 = arith.constant 0 : i32
    %51 = vector.broadcast %c0_i32_23 : i32 to vector<1x256xi32>
    %52 = arith.cmpi sge, %50, %51 : vector<1x256xi32>
    %c16_i32_24 = arith.constant 16 : i32
    %53 = vector.broadcast %c16_i32_24 : i32 to vector<1x256xi32>
    %54 = arith.cmpi slt, %50, %53 : vector<1x256xi32>
    %55 = arith.andi %52, %54 : vector<1x256xi1>
    %c1_i32_25 = arith.constant 1 : i32
    %56 = vector.broadcast %c1_i32_25 : i32 to vector<1x256xi32>
    %57 = arith.addi %27, %56 : vector<1x256xi32>
    %c0_i32_26 = arith.constant 0 : i32
    %58 = vector.broadcast %c0_i32_26 : i32 to vector<1x256xi32>
    %59 = arith.cmpi sge, %57, %58 : vector<1x256xi32>
    %c16_i32_27 = arith.constant 16 : i32
    %60 = vector.broadcast %c16_i32_27 : i32 to vector<1x256xi32>
    %61 = arith.cmpi slt, %57, %60 : vector<1x256xi32>
    %62 = arith.andi %59, %61 : vector<1x256xi1>
    %c2_i32 = arith.constant 2 : i32
    %63 = vector.broadcast %c2_i32 : i32 to vector<1x256xi32>
    %64 = arith.addi %27, %63 : vector<1x256xi32>
    %c0_i32_28 = arith.constant 0 : i32
    %65 = vector.broadcast %c0_i32_28 : i32 to vector<1x256xi32>
    %66 = arith.cmpi sge, %64, %65 : vector<1x256xi32>
    %c16_i32_29 = arith.constant 16 : i32
    %67 = vector.broadcast %c16_i32_29 : i32 to vector<1x256xi32>
    %68 = arith.cmpi slt, %64, %67 : vector<1x256xi32>
    %69 = arith.andi %66, %68 : vector<1x256xi1>
    %c3_i32 = arith.constant 3 : i32
    %70 = vector.broadcast %c3_i32 : i32 to vector<1x256xi32>
    %71 = arith.addi %27, %70 : vector<1x256xi32>
    %c0_i32_30 = arith.constant 0 : i32
    %72 = vector.broadcast %c0_i32_30 : i32 to vector<1x256xi32>
    %73 = arith.cmpi sge, %71, %72 : vector<1x256xi32>
    %c16_i32_31 = arith.constant 16 : i32
    %74 = vector.broadcast %c16_i32_31 : i32 to vector<1x256xi32>
    %75 = arith.cmpi slt, %71, %74 : vector<1x256xi32>
    %76 = arith.andi %73, %75 : vector<1x256xi1>
    %cst_32 = arith.constant 0.000000e+00 : f32
    %77 = vector.broadcast %cst_32 : f32 to vector<2x256xf32>
    %cst_33 = arith.constant 0.000000e+00 : f32
    %78 = vector.broadcast %cst_33 : f32 to vector<2x256xf32>
    %c0_34 = arith.constant 0 : index
    %79 = memref.load %arg2[%c0_34] : memref<98xf32, #tpu.memory_space<smem>>
    %c0_35 = arith.constant 0 : index
    %c77 = arith.constant 77 : index
    %80 = vector.load %arg4[%c0_35, %c77] : memref<2x512xf32, #tpu.memory_space<vmem>>, vector<2x256xf32>
    %81 = vector.broadcast %79 : f32 to vector<2x256xf32>
    %82 = arith.mulf %81, %80 : vector<2x256xf32>
    %83 = arith.addf %78, %82 : vector<2x256xf32>
    %c7 = arith.constant 7 : index
    %84 = memref.load %arg2[%c7] : memref<98xf32, #tpu.memory_space<smem>>
    %c0_36 = arith.constant 0 : index
    %c93 = arith.constant 93 : index
    %85 = vector.load %arg4[%c0_36, %c93] : memref<2x512xf32, #tpu.memory_space<vmem>>, vector<2x256xf32>
    %86 = vector.broadcast %84 : f32 to vector<2x256xf32>
    %87 = arith.mulf %86, %85 : vector<2x256xf32>
    %88 = arith.addf %83, %87 : vector<2x256xf32>
    %c14 = arith.constant 14 : index
    %89 = memref.load %arg2[%c14] : memref<98xf32, #tpu.memory_space<smem>>
    %c0_37 = arith.constant 0 : index
    %c109 = arith.constant 109 : index
    %90 = vector.load %arg4[%c0_37, %c109] : memref<2x512xf32, #tpu.memory_space<vmem>>, vector<2x256xf32>
    %91 = vector.broadcast %89 : f32 to vector<2x256xf32>
    %92 = arith.mulf %91, %90 : vector<2x256xf32>
    %93 = arith.addf %88, %92 : vector<2x256xf32>
    %c21 = arith.constant 21 : index
    %94 = memref.load %arg2[%c21] : memref<98xf32, #tpu.memory_space<smem>>
    %c0_38 = arith.constant 0 : index
    %c125 = arith.constant 125 : index
    %95 = vector.load %arg4[%c0_38, %c125] : memref<2x512xf32, #tpu.memory_space<vmem>>, vector<2x256xf32>
    %96 = vector.broadcast %94 : f32 to vector<2x256xf32>
    %97 = arith.mulf %96, %95 : vector<2x256xf32>
    %98 = arith.addf %93, %97 : vector<2x256xf32>
    %c28 = arith.constant 28 : index
    %99 = memref.load %arg2[%c28] : memref<98xf32, #tpu.memory_space<smem>>
    %c0_39 = arith.constant 0 : index
    %c141 = arith.constant 141 : index
    %100 = vector.load %arg4[%c0_39, %c141] : memref<2x512xf32, #tpu.memory_space<vmem>>, vector<2x256xf32>
    %101 = vector.broadcast %99 : f32 to vector<2x256xf32>
    %102 = arith.mulf %101, %100 : vector<2x256xf32>
    %103 = arith.addf %98, %102 : vector<2x256xf32>
    %c35 = arith.constant 35 : index
    %104 = memref.load %arg2[%c35] : memref<98xf32, #tpu.memory_space<smem>>
    %c0_40 = arith.constant 0 : index
    %c157 = arith.constant 157 : index
    %105 = vector.load %arg4[%c0_40, %c157] : memref<2x512xf32, #tpu.memory_space<vmem>>, vector<2x256xf32>
    %106 = vector.broadcast %104 : f32 to vector<2x256xf32>
    %107 = arith.mulf %106, %105 : vector<2x256xf32>
    %108 = arith.addf %103, %107 : vector<2x256xf32>
    %c42 = arith.constant 42 : index
    %109 = memref.load %arg2[%c42] : memref<98xf32, #tpu.memory_space<smem>>
    %c0_41 = arith.constant 0 : index
    %c173 = arith.constant 173 : index
    %110 = vector.load %arg4[%c0_41, %c173] : memref<2x512xf32, #tpu.memory_space<vmem>>, vector<2x256xf32>
    %111 = vector.broadcast %109 : f32 to vector<2x256xf32>
    %112 = arith.mulf %111, %110 : vector<2x256xf32>
    %113 = arith.addf %108, %112 : vector<2x256xf32>
    %c49 = arith.constant 49 : index
    %114 = memref.load %arg2[%c49] : memref<98xf32, #tpu.memory_space<smem>>
    %c0_42 = arith.constant 0 : index
    %c77_43 = arith.constant 77 : index
    %115 = vector.load %arg5[%c0_42, %c77_43] : memref<2x512xf32, #tpu.memory_space<vmem>>, vector<2x256xf32>
    %116 = vector.broadcast %114 : f32 to vector<2x256xf32>
    %117 = arith.mulf %116, %115 : vector<2x256xf32>
    %118 = arith.addf %113, %117 : vector<2x256xf32>
    %c56 = arith.constant 56 : index
    %119 = memref.load %arg2[%c56] : memref<98xf32, #tpu.memory_space<smem>>
    %c0_44 = arith.constant 0 : index
    %c93_45 = arith.constant 93 : index
    %120 = vector.load %arg5[%c0_44, %c93_45] : memref<2x512xf32, #tpu.memory_space<vmem>>, vector<2x256xf32>
    %121 = vector.broadcast %119 : f32 to vector<2x256xf32>
    %122 = arith.mulf %121, %120 : vector<2x256xf32>
    %123 = arith.addf %118, %122 : vector<2x256xf32>
    %c63 = arith.constant 63 : index
    %124 = memref.load %arg2[%c63] : memref<98xf32, #tpu.memory_space<smem>>
    %c0_46 = arith.constant 0 : index
    %c109_47 = arith.constant 109 : index
    %125 = vector.load %arg5[%c0_46, %c109_47] : memref<2x512xf32, #tpu.memory_space<vmem>>, vector<2x256xf32>
    %126 = vector.broadcast %124 : f32 to vector<2x256xf32>
    %127 = arith.mulf %126, %125 : vector<2x256xf32>
    %128 = arith.addf %123, %127 : vector<2x256xf32>
    %c70 = arith.constant 70 : index
    %129 = memref.load %arg2[%c70] : memref<98xf32, #tpu.memory_space<smem>>
    %c0_48 = arith.constant 0 : index
    %c125_49 = arith.constant 125 : index
    %130 = vector.load %arg5[%c0_48, %c125_49] : memref<2x512xf32, #tpu.memory_space<vmem>>, vector<2x256xf32>
    %131 = vector.broadcast %129 : f32 to vector<2x256xf32>
    %132 = arith.mulf %131, %130 : vector<2x256xf32>
    %133 = arith.addf %128, %132 : vector<2x256xf32>
    %c77_50 = arith.constant 77 : index
    %134 = memref.load %arg2[%c77_50] : memref<98xf32, #tpu.memory_space<smem>>
    %c0_51 = arith.constant 0 : index
    %c141_52 = arith.constant 141 : index
    %135 = vector.load %arg5[%c0_51, %c141_52] : memref<2x512xf32, #tpu.memory_space<vmem>>, vector<2x256xf32>
    %136 = vector.broadcast %134 : f32 to vector<2x256xf32>
    %137 = arith.mulf %136, %135 : vector<2x256xf32>
    %138 = arith.addf %133, %137 : vector<2x256xf32>
    %c84 = arith.constant 84 : index
    %139 = memref.load %arg2[%c84] : memref<98xf32, #tpu.memory_space<smem>>
    %c0_53 = arith.constant 0 : index
    %c157_54 = arith.constant 157 : index
    %140 = vector.load %arg5[%c0_53, %c157_54] : memref<2x512xf32, #tpu.memory_space<vmem>>, vector<2x256xf32>
    %141 = vector.broadcast %139 : f32 to vector<2x256xf32>
    %142 = arith.mulf %141, %140 : vector<2x256xf32>
    %143 = arith.addf %138, %142 : vector<2x256xf32>
    %c91 = arith.constant 91 : index
    %144 = memref.load %arg2[%c91] : memref<98xf32, #tpu.memory_space<smem>>
    %c0_55 = arith.constant 0 : index
    %c173_56 = arith.constant 173 : index
    %145 = vector.load %arg5[%c0_55, %c173_56] : memref<2x512xf32, #tpu.memory_space<vmem>>, vector<2x256xf32>
    %146 = vector.broadcast %144 : f32 to vector<2x256xf32>
    %147 = arith.mulf %146, %145 : vector<2x256xf32>
    %148 = arith.addf %143, %147 : vector<2x256xf32>
    %cst_57 = arith.constant 0.000000e+00 : f32
    %149 = vector.shape_cast %34 : vector<1x256xi1> to vector<1x256xi1>
    %150 = vector.broadcast %149 : vector<1x256xi1> to vector<2x256xi1>
    %151 = vector.broadcast %cst_57 : f32 to vector<2x256xf32>
    %152 = arith.select %150, %148, %151 : vector<2x256xi1>, vector<2x256xf32>
    %153 = arith.addf %77, %152 : vector<2x256xf32>
    %cst_58 = arith.constant 0.000000e+00 : f32
    %154 = vector.broadcast %cst_58 : f32 to vector<2x256xf32>
    %c1 = arith.constant 1 : index
    %155 = memref.load %arg2[%c1] : memref<98xf32, #tpu.memory_space<smem>>
    %c0_59 = arith.constant 0 : index
    %c78 = arith.constant 78 : index
    %156 = vector.load %arg4[%c0_59, %c78] : memref<2x512xf32, #tpu.memory_space<vmem>>, vector<2x256xf32>
    %157 = vector.broadcast %155 : f32 to vector<2x256xf32>
    %158 = arith.mulf %157, %156 : vector<2x256xf32>
    %159 = arith.addf %154, %158 : vector<2x256xf32>
    %c8 = arith.constant 8 : index
    %160 = memref.load %arg2[%c8] : memref<98xf32, #tpu.memory_space<smem>>
    %c0_60 = arith.constant 0 : index
    %c94 = arith.constant 94 : index
    %161 = vector.load %arg4[%c0_60, %c94] : memref<2x512xf32, #tpu.memory_space<vmem>>, vector<2x256xf32>
    %162 = vector.broadcast %160 : f32 to vector<2x256xf32>
    %163 = arith.mulf %162, %161 : vector<2x256xf32>
    %164 = arith.addf %159, %163 : vector<2x256xf32>
    %c15 = arith.constant 15 : index
    %165 = memref.load %arg2[%c15] : memref<98xf32, #tpu.memory_space<smem>>
    %c0_61 = arith.constant 0 : index
    %c110 = arith.constant 110 : index
    %166 = vector.load %arg4[%c0_61, %c110] : memref<2x512xf32, #tpu.memory_space<vmem>>, vector<2x256xf32>
    %167 = vector.broadcast %165 : f32 to vector<2x256xf32>
    %168 = arith.mulf %167, %166 : vector<2x256xf32>
    %169 = arith.addf %164, %168 : vector<2x256xf32>
    %c22 = arith.constant 22 : index
    %170 = memref.load %arg2[%c22] : memref<98xf32, #tpu.memory_space<smem>>
    %c0_62 = arith.constant 0 : index
    %c126 = arith.constant 126 : index
    %171 = vector.load %arg4[%c0_62, %c126] : memref<2x512xf32, #tpu.memory_space<vmem>>, vector<2x256xf32>
    %172 = vector.broadcast %170 : f32 to vector<2x256xf32>
    %173 = arith.mulf %172, %171 : vector<2x256xf32>
    %174 = arith.addf %169, %173 : vector<2x256xf32>
    %c29 = arith.constant 29 : index
    %175 = memref.load %arg2[%c29] : memref<98xf32, #tpu.memory_space<smem>>
    %c0_63 = arith.constant 0 : index
    %c142 = arith.constant 142 : index
    %176 = vector.load %arg4[%c0_63, %c142] : memref<2x512xf32, #tpu.memory_space<vmem>>, vector<2x256xf32>
    %177 = vector.broadcast %175 : f32 to vector<2x256xf32>
    %178 = arith.mulf %177, %176 : vector<2x256xf32>
    %179 = arith.addf %174, %178 : vector<2x256xf32>
    %c36 = arith.constant 36 : index
    %180 = memref.load %arg2[%c36] : memref<98xf32, #tpu.memory_space<smem>>
    %c0_64 = arith.constant 0 : index
    %c158 = arith.constant 158 : index
    %181 = vector.load %arg4[%c0_64, %c158] : memref<2x512xf32, #tpu.memory_space<vmem>>, vector<2x256xf32>
    %182 = vector.broadcast %180 : f32 to vector<2x256xf32>
    %183 = arith.mulf %182, %181 : vector<2x256xf32>
    %184 = arith.addf %179, %183 : vector<2x256xf32>
    %c43 = arith.constant 43 : index
    %185 = memref.load %arg2[%c43] : memref<98xf32, #tpu.memory_space<smem>>
    %c0_65 = arith.constant 0 : index
    %c174 = arith.constant 174 : index
    %186 = vector.load %arg4[%c0_65, %c174] : memref<2x512xf32, #tpu.memory_space<vmem>>, vector<2x256xf32>
    %187 = vector.broadcast %185 : f32 to vector<2x256xf32>
    %188 = arith.mulf %187, %186 : vector<2x256xf32>
    %189 = arith.addf %184, %188 : vector<2x256xf32>
    %c50 = arith.constant 50 : index
    %190 = memref.load %arg2[%c50] : memref<98xf32, #tpu.memory_space<smem>>
    %c0_66 = arith.constant 0 : index
    %c78_67 = arith.constant 78 : index
    %191 = vector.load %arg5[%c0_66, %c78_67] : memref<2x512xf32, #tpu.memory_space<vmem>>, vector<2x256xf32>
    %192 = vector.broadcast %190 : f32 to vector<2x256xf32>
    %193 = arith.mulf %192, %191 : vector<2x256xf32>
    %194 = arith.addf %189, %193 : vector<2x256xf32>
    %c57 = arith.constant 57 : index
    %195 = memref.load %arg2[%c57] : memref<98xf32, #tpu.memory_space<smem>>
    %c0_68 = arith.constant 0 : index
    %c94_69 = arith.constant 94 : index
    %196 = vector.load %arg5[%c0_68, %c94_69] : memref<2x512xf32, #tpu.memory_space<vmem>>, vector<2x256xf32>
    %197 = vector.broadcast %195 : f32 to vector<2x256xf32>
    %198 = arith.mulf %197, %196 : vector<2x256xf32>
    %199 = arith.addf %194, %198 : vector<2x256xf32>
    %c64 = arith.constant 64 : index
    %200 = memref.load %arg2[%c64] : memref<98xf32, #tpu.memory_space<smem>>
    %c0_70 = arith.constant 0 : index
    %c110_71 = arith.constant 110 : index
    %201 = vector.load %arg5[%c0_70, %c110_71] : memref<2x512xf32, #tpu.memory_space<vmem>>, vector<2x256xf32>
    %202 = vector.broadcast %200 : f32 to vector<2x256xf32>
    %203 = arith.mulf %202, %201 : vector<2x256xf32>
    %204 = arith.addf %199, %203 : vector<2x256xf32>
    %c71 = arith.constant 71 : index
    %205 = memref.load %arg2[%c71] : memref<98xf32, #tpu.memory_space<smem>>
    %c0_72 = arith.constant 0 : index
    %c126_73 = arith.constant 126 : index
    %206 = vector.load %arg5[%c0_72, %c126_73] : memref<2x512xf32, #tpu.memory_space<vmem>>, vector<2x256xf32>
    %207 = vector.broadcast %205 : f32 to vector<2x256xf32>
    %208 = arith.mulf %207, %206 : vector<2x256xf32>
    %209 = arith.addf %204, %208 : vector<2x256xf32>
    %c78_74 = arith.constant 78 : index
    %210 = memref.load %arg2[%c78_74] : memref<98xf32, #tpu.memory_space<smem>>
    %c0_75 = arith.constant 0 : index
    %c142_76 = arith.constant 142 : index
    %211 = vector.load %arg5[%c0_75, %c142_76] : memref<2x512xf32, #tpu.memory_space<vmem>>, vector<2x256xf32>
    %212 = vector.broadcast %210 : f32 to vector<2x256xf32>
    %213 = arith.mulf %212, %211 : vector<2x256xf32>
    %214 = arith.addf %209, %213 : vector<2x256xf32>
    %c85 = arith.constant 85 : index
    %215 = memref.load %arg2[%c85] : memref<98xf32, #tpu.memory_space<smem>>
    %c0_77 = arith.constant 0 : index
    %c158_78 = arith.constant 158 : index
    %216 = vector.load %arg5[%c0_77, %c158_78] : memref<2x512xf32, #tpu.memory_space<vmem>>, vector<2x256xf32>
    %217 = vector.broadcast %215 : f32 to vector<2x256xf32>
    %218 = arith.mulf %217, %216 : vector<2x256xf32>
    %219 = arith.addf %214, %218 : vector<2x256xf32>
    %c92 = arith.constant 92 : index
    %220 = memref.load %arg2[%c92] : memref<98xf32, #tpu.memory_space<smem>>
    %c0_79 = arith.constant 0 : index
    %c174_80 = arith.constant 174 : index
    %221 = vector.load %arg5[%c0_79, %c174_80] : memref<2x512xf32, #tpu.memory_space<vmem>>, vector<2x256xf32>
    %222 = vector.broadcast %220 : f32 to vector<2x256xf32>
    %223 = arith.mulf %222, %221 : vector<2x256xf32>
    %224 = arith.addf %219, %223 : vector<2x256xf32>
    %cst_81 = arith.constant 0.000000e+00 : f32
    %225 = vector.shape_cast %41 : vector<1x256xi1> to vector<1x256xi1>
    %226 = vector.broadcast %225 : vector<1x256xi1> to vector<2x256xi1>
    %227 = vector.broadcast %cst_81 : f32 to vector<2x256xf32>
    %228 = arith.select %226, %224, %227 : vector<2x256xi1>, vector<2x256xf32>
    %229 = arith.addf %153, %228 : vector<2x256xf32>
    %cst_82 = arith.constant 0.000000e+00 : f32
    %230 = vector.broadcast %cst_82 : f32 to vector<2x256xf32>
    %c2 = arith.constant 2 : index
    %231 = memref.load %arg2[%c2] : memref<98xf32, #tpu.memory_space<smem>>
    %c0_83 = arith.constant 0 : index
    %c79 = arith.constant 79 : index
    %232 = vector.load %arg4[%c0_83, %c79] : memref<2x512xf32, #tpu.memory_space<vmem>>, vector<2x256xf32>
    %233 = vector.broadcast %231 : f32 to vector<2x256xf32>
    %234 = arith.mulf %233, %232 : vector<2x256xf32>
    %235 = arith.addf %230, %234 : vector<2x256xf32>
    %c9 = arith.constant 9 : index
    %236 = memref.load %arg2[%c9] : memref<98xf32, #tpu.memory_space<smem>>
    %c0_84 = arith.constant 0 : index
    %c95 = arith.constant 95 : index
    %237 = vector.load %arg4[%c0_84, %c95] : memref<2x512xf32, #tpu.memory_space<vmem>>, vector<2x256xf32>
    %238 = vector.broadcast %236 : f32 to vector<2x256xf32>
    %239 = arith.mulf %238, %237 : vector<2x256xf32>
    %240 = arith.addf %235, %239 : vector<2x256xf32>
    %c16 = arith.constant 16 : index
    %241 = memref.load %arg2[%c16] : memref<98xf32, #tpu.memory_space<smem>>
    %c0_85 = arith.constant 0 : index
    %c111 = arith.constant 111 : index
    %242 = vector.load %arg4[%c0_85, %c111] : memref<2x512xf32, #tpu.memory_space<vmem>>, vector<2x256xf32>
    %243 = vector.broadcast %241 : f32 to vector<2x256xf32>
    %244 = arith.mulf %243, %242 : vector<2x256xf32>
    %245 = arith.addf %240, %244 : vector<2x256xf32>
    %c23 = arith.constant 23 : index
    %246 = memref.load %arg2[%c23] : memref<98xf32, #tpu.memory_space<smem>>
    %c0_86 = arith.constant 0 : index
    %c127 = arith.constant 127 : index
    %247 = vector.load %arg4[%c0_86, %c127] : memref<2x512xf32, #tpu.memory_space<vmem>>, vector<2x256xf32>
    %248 = vector.broadcast %246 : f32 to vector<2x256xf32>
    %249 = arith.mulf %248, %247 : vector<2x256xf32>
    %250 = arith.addf %245, %249 : vector<2x256xf32>
    %c30 = arith.constant 30 : index
    %251 = memref.load %arg2[%c30] : memref<98xf32, #tpu.memory_space<smem>>
    %c0_87 = arith.constant 0 : index
    %c143 = arith.constant 143 : index
    %252 = vector.load %arg4[%c0_87, %c143] : memref<2x512xf32, #tpu.memory_space<vmem>>, vector<2x256xf32>
    %253 = vector.broadcast %251 : f32 to vector<2x256xf32>
    %254 = arith.mulf %253, %252 : vector<2x256xf32>
    %255 = arith.addf %250, %254 : vector<2x256xf32>
    %c37 = arith.constant 37 : index
    %256 = memref.load %arg2[%c37] : memref<98xf32, #tpu.memory_space<smem>>
    %c0_88 = arith.constant 0 : index
    %c159 = arith.constant 159 : index
    %257 = vector.load %arg4[%c0_88, %c159] : memref<2x512xf32, #tpu.memory_space<vmem>>, vector<2x256xf32>
    %258 = vector.broadcast %256 : f32 to vector<2x256xf32>
    %259 = arith.mulf %258, %257 : vector<2x256xf32>
    %260 = arith.addf %255, %259 : vector<2x256xf32>
    %c44 = arith.constant 44 : index
    %261 = memref.load %arg2[%c44] : memref<98xf32, #tpu.memory_space<smem>>
    %c0_89 = arith.constant 0 : index
    %c175 = arith.constant 175 : index
    %262 = vector.load %arg4[%c0_89, %c175] : memref<2x512xf32, #tpu.memory_space<vmem>>, vector<2x256xf32>
    %263 = vector.broadcast %261 : f32 to vector<2x256xf32>
    %264 = arith.mulf %263, %262 : vector<2x256xf32>
    %265 = arith.addf %260, %264 : vector<2x256xf32>
    %c51 = arith.constant 51 : index
    %266 = memref.load %arg2[%c51] : memref<98xf32, #tpu.memory_space<smem>>
    %c0_90 = arith.constant 0 : index
    %c79_91 = arith.constant 79 : index
    %267 = vector.load %arg5[%c0_90, %c79_91] : memref<2x512xf32, #tpu.memory_space<vmem>>, vector<2x256xf32>
    %268 = vector.broadcast %266 : f32 to vector<2x256xf32>
    %269 = arith.mulf %268, %267 : vector<2x256xf32>
    %270 = arith.addf %265, %269 : vector<2x256xf32>
    %c58 = arith.constant 58 : index
    %271 = memref.load %arg2[%c58] : memref<98xf32, #tpu.memory_space<smem>>
    %c0_92 = arith.constant 0 : index
    %c95_93 = arith.constant 95 : index
    %272 = vector.load %arg5[%c0_92, %c95_93] : memref<2x512xf32, #tpu.memory_space<vmem>>, vector<2x256xf32>
    %273 = vector.broadcast %271 : f32 to vector<2x256xf32>
    %274 = arith.mulf %273, %272 : vector<2x256xf32>
    %275 = arith.addf %270, %274 : vector<2x256xf32>
    %c65 = arith.constant 65 : index
    %276 = memref.load %arg2[%c65] : memref<98xf32, #tpu.memory_space<smem>>
    %c0_94 = arith.constant 0 : index
    %c111_95 = arith.constant 111 : index
    %277 = vector.load %arg5[%c0_94, %c111_95] : memref<2x512xf32, #tpu.memory_space<vmem>>, vector<2x256xf32>
    %278 = vector.broadcast %276 : f32 to vector<2x256xf32>
    %279 = arith.mulf %278, %277 : vector<2x256xf32>
    %280 = arith.addf %275, %279 : vector<2x256xf32>
    %c72 = arith.constant 72 : index
    %281 = memref.load %arg2[%c72] : memref<98xf32, #tpu.memory_space<smem>>
    %c0_96 = arith.constant 0 : index
    %c127_97 = arith.constant 127 : index
    %282 = vector.load %arg5[%c0_96, %c127_97] : memref<2x512xf32, #tpu.memory_space<vmem>>, vector<2x256xf32>
    %283 = vector.broadcast %281 : f32 to vector<2x256xf32>
    %284 = arith.mulf %283, %282 : vector<2x256xf32>
    %285 = arith.addf %280, %284 : vector<2x256xf32>
    %c79_98 = arith.constant 79 : index
    %286 = memref.load %arg2[%c79_98] : memref<98xf32, #tpu.memory_space<smem>>
    %c0_99 = arith.constant 0 : index
    %c143_100 = arith.constant 143 : index
    %287 = vector.load %arg5[%c0_99, %c143_100] : memref<2x512xf32, #tpu.memory_space<vmem>>, vector<2x256xf32>
    %288 = vector.broadcast %286 : f32 to vector<2x256xf32>
    %289 = arith.mulf %288, %287 : vector<2x256xf32>
    %290 = arith.addf %285, %289 : vector<2x256xf32>
    %c86 = arith.constant 86 : index
    %291 = memref.load %arg2[%c86] : memref<98xf32, #tpu.memory_space<smem>>
    %c0_101 = arith.constant 0 : index
    %c159_102 = arith.constant 159 : index
    %292 = vector.load %arg5[%c0_101, %c159_102] : memref<2x512xf32, #tpu.memory_space<vmem>>, vector<2x256xf32>
    %293 = vector.broadcast %291 : f32 to vector<2x256xf32>
    %294 = arith.mulf %293, %292 : vector<2x256xf32>
    %295 = arith.addf %290, %294 : vector<2x256xf32>
    %c93_103 = arith.constant 93 : index
    %296 = memref.load %arg2[%c93_103] : memref<98xf32, #tpu.memory_space<smem>>
    %c0_104 = arith.constant 0 : index
    %c175_105 = arith.constant 175 : index
    %297 = vector.load %arg5[%c0_104, %c175_105] : memref<2x512xf32, #tpu.memory_space<vmem>>, vector<2x256xf32>
    %298 = vector.broadcast %296 : f32 to vector<2x256xf32>
    %299 = arith.mulf %298, %297 : vector<2x256xf32>
    %300 = arith.addf %295, %299 : vector<2x256xf32>
    %cst_106 = arith.constant 0.000000e+00 : f32
    %301 = vector.shape_cast %48 : vector<1x256xi1> to vector<1x256xi1>
    %302 = vector.broadcast %301 : vector<1x256xi1> to vector<2x256xi1>
    %303 = vector.broadcast %cst_106 : f32 to vector<2x256xf32>
    %304 = arith.select %302, %300, %303 : vector<2x256xi1>, vector<2x256xf32>
    %305 = arith.addf %229, %304 : vector<2x256xf32>
    %cst_107 = arith.constant 0.000000e+00 : f32
    %306 = vector.broadcast %cst_107 : f32 to vector<2x256xf32>
    %c3 = arith.constant 3 : index
    %307 = memref.load %arg2[%c3] : memref<98xf32, #tpu.memory_space<smem>>
    %c0_108 = arith.constant 0 : index
    %c80 = arith.constant 80 : index
    %308 = vector.load %arg4[%c0_108, %c80] : memref<2x512xf32, #tpu.memory_space<vmem>>, vector<2x256xf32>
    %309 = vector.broadcast %307 : f32 to vector<2x256xf32>
    %310 = arith.mulf %309, %308 : vector<2x256xf32>
    %311 = arith.addf %306, %310 : vector<2x256xf32>
    %c10 = arith.constant 10 : index
    %312 = memref.load %arg2[%c10] : memref<98xf32, #tpu.memory_space<smem>>
    %c0_109 = arith.constant 0 : index
    %c96 = arith.constant 96 : index
    %313 = vector.load %arg4[%c0_109, %c96] : memref<2x512xf32, #tpu.memory_space<vmem>>, vector<2x256xf32>
    %314 = vector.broadcast %312 : f32 to vector<2x256xf32>
    %315 = arith.mulf %314, %313 : vector<2x256xf32>
    %316 = arith.addf %311, %315 : vector<2x256xf32>
    %c17 = arith.constant 17 : index
    %317 = memref.load %arg2[%c17] : memref<98xf32, #tpu.memory_space<smem>>
    %c0_110 = arith.constant 0 : index
    %c112 = arith.constant 112 : index
    %318 = vector.load %arg4[%c0_110, %c112] : memref<2x512xf32, #tpu.memory_space<vmem>>, vector<2x256xf32>
    %319 = vector.broadcast %317 : f32 to vector<2x256xf32>
    %320 = arith.mulf %319, %318 : vector<2x256xf32>
    %321 = arith.addf %316, %320 : vector<2x256xf32>
    %c24 = arith.constant 24 : index
    %322 = memref.load %arg2[%c24] : memref<98xf32, #tpu.memory_space<smem>>
    %c0_111 = arith.constant 0 : index
    %c128_112 = arith.constant 128 : index
    %323 = vector.load %arg4[%c0_111, %c128_112] : memref<2x512xf32, #tpu.memory_space<vmem>>, vector<2x256xf32>
    %324 = vector.broadcast %322 : f32 to vector<2x256xf32>
    %325 = arith.mulf %324, %323 : vector<2x256xf32>
    %326 = arith.addf %321, %325 : vector<2x256xf32>
    %c31 = arith.constant 31 : index
    %327 = memref.load %arg2[%c31] : memref<98xf32, #tpu.memory_space<smem>>
    %c0_113 = arith.constant 0 : index
    %c144 = arith.constant 144 : index
    %328 = vector.load %arg4[%c0_113, %c144] : memref<2x512xf32, #tpu.memory_space<vmem>>, vector<2x256xf32>
    %329 = vector.broadcast %327 : f32 to vector<2x256xf32>
    %330 = arith.mulf %329, %328 : vector<2x256xf32>
    %331 = arith.addf %326, %330 : vector<2x256xf32>
    %c38 = arith.constant 38 : index
    %332 = memref.load %arg2[%c38] : memref<98xf32, #tpu.memory_space<smem>>
    %c0_114 = arith.constant 0 : index
    %c160 = arith.constant 160 : index
    %333 = vector.load %arg4[%c0_114, %c160] : memref<2x512xf32, #tpu.memory_space<vmem>>, vector<2x256xf32>
    %334 = vector.broadcast %332 : f32 to vector<2x256xf32>
    %335 = arith.mulf %334, %333 : vector<2x256xf32>
    %336 = arith.addf %331, %335 : vector<2x256xf32>
    %c45 = arith.constant 45 : index
    %337 = memref.load %arg2[%c45] : memref<98xf32, #tpu.memory_space<smem>>
    %c0_115 = arith.constant 0 : index
    %c176 = arith.constant 176 : index
    %338 = vector.load %arg4[%c0_115, %c176] : memref<2x512xf32, #tpu.memory_space<vmem>>, vector<2x256xf32>
    %339 = vector.broadcast %337 : f32 to vector<2x256xf32>
    %340 = arith.mulf %339, %338 : vector<2x256xf32>
    %341 = arith.addf %336, %340 : vector<2x256xf32>
    %c52 = arith.constant 52 : index
    %342 = memref.load %arg2[%c52] : memref<98xf32, #tpu.memory_space<smem>>
    %c0_116 = arith.constant 0 : index
    %c80_117 = arith.constant 80 : index
    %343 = vector.load %arg5[%c0_116, %c80_117] : memref<2x512xf32, #tpu.memory_space<vmem>>, vector<2x256xf32>
    %344 = vector.broadcast %342 : f32 to vector<2x256xf32>
    %345 = arith.mulf %344, %343 : vector<2x256xf32>
    %346 = arith.addf %341, %345 : vector<2x256xf32>
    %c59 = arith.constant 59 : index
    %347 = memref.load %arg2[%c59] : memref<98xf32, #tpu.memory_space<smem>>
    %c0_118 = arith.constant 0 : index
    %c96_119 = arith.constant 96 : index
    %348 = vector.load %arg5[%c0_118, %c96_119] : memref<2x512xf32, #tpu.memory_space<vmem>>, vector<2x256xf32>
    %349 = vector.broadcast %347 : f32 to vector<2x256xf32>
    %350 = arith.mulf %349, %348 : vector<2x256xf32>
    %351 = arith.addf %346, %350 : vector<2x256xf32>
    %c66 = arith.constant 66 : index
    %352 = memref.load %arg2[%c66] : memref<98xf32, #tpu.memory_space<smem>>
    %c0_120 = arith.constant 0 : index
    %c112_121 = arith.constant 112 : index
    %353 = vector.load %arg5[%c0_120, %c112_121] : memref<2x512xf32, #tpu.memory_space<vmem>>, vector<2x256xf32>
    %354 = vector.broadcast %352 : f32 to vector<2x256xf32>
    %355 = arith.mulf %354, %353 : vector<2x256xf32>
    %356 = arith.addf %351, %355 : vector<2x256xf32>
    %c73 = arith.constant 73 : index
    %357 = memref.load %arg2[%c73] : memref<98xf32, #tpu.memory_space<smem>>
    %c0_122 = arith.constant 0 : index
    %c128_123 = arith.constant 128 : index
    %358 = vector.load %arg5[%c0_122, %c128_123] : memref<2x512xf32, #tpu.memory_space<vmem>>, vector<2x256xf32>
    %359 = vector.broadcast %357 : f32 to vector<2x256xf32>
    %360 = arith.mulf %359, %358 : vector<2x256xf32>
    %361 = arith.addf %356, %360 : vector<2x256xf32>
    %c80_124 = arith.constant 80 : index
    %362 = memref.load %arg2[%c80_124] : memref<98xf32, #tpu.memory_space<smem>>
    %c0_125 = arith.constant 0 : index
    %c144_126 = arith.constant 144 : index
    %363 = vector.load %arg5[%c0_125, %c144_126] : memref<2x512xf32, #tpu.memory_space<vmem>>, vector<2x256xf32>
    %364 = vector.broadcast %362 : f32 to vector<2x256xf32>
    %365 = arith.mulf %364, %363 : vector<2x256xf32>
    %366 = arith.addf %361, %365 : vector<2x256xf32>
    %c87 = arith.constant 87 : index
    %367 = memref.load %arg2[%c87] : memref<98xf32, #tpu.memory_space<smem>>
    %c0_127 = arith.constant 0 : index
    %c160_128 = arith.constant 160 : index
    %368 = vector.load %arg5[%c0_127, %c160_128] : memref<2x512xf32, #tpu.memory_space<vmem>>, vector<2x256xf32>
    %369 = vector.broadcast %367 : f32 to vector<2x256xf32>
    %370 = arith.mulf %369, %368 : vector<2x256xf32>
    %371 = arith.addf %366, %370 : vector<2x256xf32>
    %c94_129 = arith.constant 94 : index
    %372 = memref.load %arg2[%c94_129] : memref<98xf32, #tpu.memory_space<smem>>
    %c0_130 = arith.constant 0 : index
    %c176_131 = arith.constant 176 : index
    %373 = vector.load %arg5[%c0_130, %c176_131] : memref<2x512xf32, #tpu.memory_space<vmem>>, vector<2x256xf32>
    %374 = vector.broadcast %372 : f32 to vector<2x256xf32>
    %375 = arith.mulf %374, %373 : vector<2x256xf32>
    %376 = arith.addf %371, %375 : vector<2x256xf32>
    %cst_132 = arith.constant 0.000000e+00 : f32
    %377 = vector.shape_cast %55 : vector<1x256xi1> to vector<1x256xi1>
    %378 = vector.broadcast %377 : vector<1x256xi1> to vector<2x256xi1>
    %379 = vector.broadcast %cst_132 : f32 to vector<2x256xf32>
    %380 = arith.select %378, %376, %379 : vector<2x256xi1>, vector<2x256xf32>
    %381 = arith.addf %305, %380 : vector<2x256xf32>
    %cst_133 = arith.constant 0.000000e+00 : f32
    %382 = vector.broadcast %cst_133 : f32 to vector<2x256xf32>
    %c4 = arith.constant 4 : index
    %383 = memref.load %arg2[%c4] : memref<98xf32, #tpu.memory_space<smem>>
    %c0_134 = arith.constant 0 : index
    %c81 = arith.constant 81 : index
    %384 = vector.load %arg4[%c0_134, %c81] : memref<2x512xf32, #tpu.memory_space<vmem>>, vector<2x256xf32>
    %385 = vector.broadcast %383 : f32 to vector<2x256xf32>
    %386 = arith.mulf %385, %384 : vector<2x256xf32>
    %387 = arith.addf %382, %386 : vector<2x256xf32>
    %c11 = arith.constant 11 : index
    %388 = memref.load %arg2[%c11] : memref<98xf32, #tpu.memory_space<smem>>
    %c0_135 = arith.constant 0 : index
    %c97 = arith.constant 97 : index
    %389 = vector.load %arg4[%c0_135, %c97] : memref<2x512xf32, #tpu.memory_space<vmem>>, vector<2x256xf32>
    %390 = vector.broadcast %388 : f32 to vector<2x256xf32>
    %391 = arith.mulf %390, %389 : vector<2x256xf32>
    %392 = arith.addf %387, %391 : vector<2x256xf32>
    %c18 = arith.constant 18 : index
    %393 = memref.load %arg2[%c18] : memref<98xf32, #tpu.memory_space<smem>>
    %c0_136 = arith.constant 0 : index
    %c113 = arith.constant 113 : index
    %394 = vector.load %arg4[%c0_136, %c113] : memref<2x512xf32, #tpu.memory_space<vmem>>, vector<2x256xf32>
    %395 = vector.broadcast %393 : f32 to vector<2x256xf32>
    %396 = arith.mulf %395, %394 : vector<2x256xf32>
    %397 = arith.addf %392, %396 : vector<2x256xf32>
    %c25 = arith.constant 25 : index
    %398 = memref.load %arg2[%c25] : memref<98xf32, #tpu.memory_space<smem>>
    %c0_137 = arith.constant 0 : index
    %c129 = arith.constant 129 : index
    %399 = vector.load %arg4[%c0_137, %c129] : memref<2x512xf32, #tpu.memory_space<vmem>>, vector<2x256xf32>
    %400 = vector.broadcast %398 : f32 to vector<2x256xf32>
    %401 = arith.mulf %400, %399 : vector<2x256xf32>
    %402 = arith.addf %397, %401 : vector<2x256xf32>
    %c32 = arith.constant 32 : index
    %403 = memref.load %arg2[%c32] : memref<98xf32, #tpu.memory_space<smem>>
    %c0_138 = arith.constant 0 : index
    %c145 = arith.constant 145 : index
    %404 = vector.load %arg4[%c0_138, %c145] : memref<2x512xf32, #tpu.memory_space<vmem>>, vector<2x256xf32>
    %405 = vector.broadcast %403 : f32 to vector<2x256xf32>
    %406 = arith.mulf %405, %404 : vector<2x256xf32>
    %407 = arith.addf %402, %406 : vector<2x256xf32>
    %c39 = arith.constant 39 : index
    %408 = memref.load %arg2[%c39] : memref<98xf32, #tpu.memory_space<smem>>
    %c0_139 = arith.constant 0 : index
    %c161 = arith.constant 161 : index
    %409 = vector.load %arg4[%c0_139, %c161] : memref<2x512xf32, #tpu.memory_space<vmem>>, vector<2x256xf32>
    %410 = vector.broadcast %408 : f32 to vector<2x256xf32>
    %411 = arith.mulf %410, %409 : vector<2x256xf32>
    %412 = arith.addf %407, %411 : vector<2x256xf32>
    %c46 = arith.constant 46 : index
    %413 = memref.load %arg2[%c46] : memref<98xf32, #tpu.memory_space<smem>>
    %c0_140 = arith.constant 0 : index
    %c177 = arith.constant 177 : index
    %414 = vector.load %arg4[%c0_140, %c177] : memref<2x512xf32, #tpu.memory_space<vmem>>, vector<2x256xf32>
    %415 = vector.broadcast %413 : f32 to vector<2x256xf32>
    %416 = arith.mulf %415, %414 : vector<2x256xf32>
    %417 = arith.addf %412, %416 : vector<2x256xf32>
    %c53 = arith.constant 53 : index
    %418 = memref.load %arg2[%c53] : memref<98xf32, #tpu.memory_space<smem>>
    %c0_141 = arith.constant 0 : index
    %c81_142 = arith.constant 81 : index
    %419 = vector.load %arg5[%c0_141, %c81_142] : memref<2x512xf32, #tpu.memory_space<vmem>>, vector<2x256xf32>
    %420 = vector.broadcast %418 : f32 to vector<2x256xf32>
    %421 = arith.mulf %420, %419 : vector<2x256xf32>
    %422 = arith.addf %417, %421 : vector<2x256xf32>
    %c60 = arith.constant 60 : index
    %423 = memref.load %arg2[%c60] : memref<98xf32, #tpu.memory_space<smem>>
    %c0_143 = arith.constant 0 : index
    %c97_144 = arith.constant 97 : index
    %424 = vector.load %arg5[%c0_143, %c97_144] : memref<2x512xf32, #tpu.memory_space<vmem>>, vector<2x256xf32>
    %425 = vector.broadcast %423 : f32 to vector<2x256xf32>
    %426 = arith.mulf %425, %424 : vector<2x256xf32>
    %427 = arith.addf %422, %426 : vector<2x256xf32>
    %c67 = arith.constant 67 : index
    %428 = memref.load %arg2[%c67] : memref<98xf32, #tpu.memory_space<smem>>
    %c0_145 = arith.constant 0 : index
    %c113_146 = arith.constant 113 : index
    %429 = vector.load %arg5[%c0_145, %c113_146] : memref<2x512xf32, #tpu.memory_space<vmem>>, vector<2x256xf32>
    %430 = vector.broadcast %428 : f32 to vector<2x256xf32>
    %431 = arith.mulf %430, %429 : vector<2x256xf32>
    %432 = arith.addf %427, %431 : vector<2x256xf32>
    %c74 = arith.constant 74 : index
    %433 = memref.load %arg2[%c74] : memref<98xf32, #tpu.memory_space<smem>>
    %c0_147 = arith.constant 0 : index
    %c129_148 = arith.constant 129 : index
    %434 = vector.load %arg5[%c0_147, %c129_148] : memref<2x512xf32, #tpu.memory_space<vmem>>, vector<2x256xf32>
    %435 = vector.broadcast %433 : f32 to vector<2x256xf32>
    %436 = arith.mulf %435, %434 : vector<2x256xf32>
    %437 = arith.addf %432, %436 : vector<2x256xf32>
    %c81_149 = arith.constant 81 : index
    %438 = memref.load %arg2[%c81_149] : memref<98xf32, #tpu.memory_space<smem>>
    %c0_150 = arith.constant 0 : index
    %c145_151 = arith.constant 145 : index
    %439 = vector.load %arg5[%c0_150, %c145_151] : memref<2x512xf32, #tpu.memory_space<vmem>>, vector<2x256xf32>
    %440 = vector.broadcast %438 : f32 to vector<2x256xf32>
    %441 = arith.mulf %440, %439 : vector<2x256xf32>
    %442 = arith.addf %437, %441 : vector<2x256xf32>
    %c88 = arith.constant 88 : index
    %443 = memref.load %arg2[%c88] : memref<98xf32, #tpu.memory_space<smem>>
    %c0_152 = arith.constant 0 : index
    %c161_153 = arith.constant 161 : index
    %444 = vector.load %arg5[%c0_152, %c161_153] : memref<2x512xf32, #tpu.memory_space<vmem>>, vector<2x256xf32>
    %445 = vector.broadcast %443 : f32 to vector<2x256xf32>
    %446 = arith.mulf %445, %444 : vector<2x256xf32>
    %447 = arith.addf %442, %446 : vector<2x256xf32>
    %c95_154 = arith.constant 95 : index
    %448 = memref.load %arg2[%c95_154] : memref<98xf32, #tpu.memory_space<smem>>
    %c0_155 = arith.constant 0 : index
    %c177_156 = arith.constant 177 : index
    %449 = vector.load %arg5[%c0_155, %c177_156] : memref<2x512xf32, #tpu.memory_space<vmem>>, vector<2x256xf32>
    %450 = vector.broadcast %448 : f32 to vector<2x256xf32>
    %451 = arith.mulf %450, %449 : vector<2x256xf32>
    %452 = arith.addf %447, %451 : vector<2x256xf32>
    %cst_157 = arith.constant 0.000000e+00 : f32
    %453 = vector.shape_cast %62 : vector<1x256xi1> to vector<1x256xi1>
    %454 = vector.broadcast %453 : vector<1x256xi1> to vector<2x256xi1>
    %455 = vector.broadcast %cst_157 : f32 to vector<2x256xf32>
    %456 = arith.select %454, %452, %455 : vector<2x256xi1>, vector<2x256xf32>
    %457 = arith.addf %381, %456 : vector<2x256xf32>
    %cst_158 = arith.constant 0.000000e+00 : f32
    %458 = vector.broadcast %cst_158 : f32 to vector<2x256xf32>
    %c5 = arith.constant 5 : index
    %459 = memref.load %arg2[%c5] : memref<98xf32, #tpu.memory_space<smem>>
    %c0_159 = arith.constant 0 : index
    %c82 = arith.constant 82 : index
    %460 = vector.load %arg4[%c0_159, %c82] : memref<2x512xf32, #tpu.memory_space<vmem>>, vector<2x256xf32>
    %461 = vector.broadcast %459 : f32 to vector<2x256xf32>
    %462 = arith.mulf %461, %460 : vector<2x256xf32>
    %463 = arith.addf %458, %462 : vector<2x256xf32>
    %c12 = arith.constant 12 : index
    %464 = memref.load %arg2[%c12] : memref<98xf32, #tpu.memory_space<smem>>
    %c0_160 = arith.constant 0 : index
    %c98 = arith.constant 98 : index
    %465 = vector.load %arg4[%c0_160, %c98] : memref<2x512xf32, #tpu.memory_space<vmem>>, vector<2x256xf32>
    %466 = vector.broadcast %464 : f32 to vector<2x256xf32>
    %467 = arith.mulf %466, %465 : vector<2x256xf32>
    %468 = arith.addf %463, %467 : vector<2x256xf32>
    %c19 = arith.constant 19 : index
    %469 = memref.load %arg2[%c19] : memref<98xf32, #tpu.memory_space<smem>>
    %c0_161 = arith.constant 0 : index
    %c114 = arith.constant 114 : index
    %470 = vector.load %arg4[%c0_161, %c114] : memref<2x512xf32, #tpu.memory_space<vmem>>, vector<2x256xf32>
    %471 = vector.broadcast %469 : f32 to vector<2x256xf32>
    %472 = arith.mulf %471, %470 : vector<2x256xf32>
    %473 = arith.addf %468, %472 : vector<2x256xf32>
    %c26 = arith.constant 26 : index
    %474 = memref.load %arg2[%c26] : memref<98xf32, #tpu.memory_space<smem>>
    %c0_162 = arith.constant 0 : index
    %c130 = arith.constant 130 : index
    %475 = vector.load %arg4[%c0_162, %c130] : memref<2x512xf32, #tpu.memory_space<vmem>>, vector<2x256xf32>
    %476 = vector.broadcast %474 : f32 to vector<2x256xf32>
    %477 = arith.mulf %476, %475 : vector<2x256xf32>
    %478 = arith.addf %473, %477 : vector<2x256xf32>
    %c33 = arith.constant 33 : index
    %479 = memref.load %arg2[%c33] : memref<98xf32, #tpu.memory_space<smem>>
    %c0_163 = arith.constant 0 : index
    %c146 = arith.constant 146 : index
    %480 = vector.load %arg4[%c0_163, %c146] : memref<2x512xf32, #tpu.memory_space<vmem>>, vector<2x256xf32>
    %481 = vector.broadcast %479 : f32 to vector<2x256xf32>
    %482 = arith.mulf %481, %480 : vector<2x256xf32>
    %483 = arith.addf %478, %482 : vector<2x256xf32>
    %c40 = arith.constant 40 : index
    %484 = memref.load %arg2[%c40] : memref<98xf32, #tpu.memory_space<smem>>
    %c0_164 = arith.constant 0 : index
    %c162 = arith.constant 162 : index
    %485 = vector.load %arg4[%c0_164, %c162] : memref<2x512xf32, #tpu.memory_space<vmem>>, vector<2x256xf32>
    %486 = vector.broadcast %484 : f32 to vector<2x256xf32>
    %487 = arith.mulf %486, %485 : vector<2x256xf32>
    %488 = arith.addf %483, %487 : vector<2x256xf32>
    %c47 = arith.constant 47 : index
    %489 = memref.load %arg2[%c47] : memref<98xf32, #tpu.memory_space<smem>>
    %c0_165 = arith.constant 0 : index
    %c178 = arith.constant 178 : index
    %490 = vector.load %arg4[%c0_165, %c178] : memref<2x512xf32, #tpu.memory_space<vmem>>, vector<2x256xf32>
    %491 = vector.broadcast %489 : f32 to vector<2x256xf32>
    %492 = arith.mulf %491, %490 : vector<2x256xf32>
    %493 = arith.addf %488, %492 : vector<2x256xf32>
    %c54 = arith.constant 54 : index
    %494 = memref.load %arg2[%c54] : memref<98xf32, #tpu.memory_space<smem>>
    %c0_166 = arith.constant 0 : index
    %c82_167 = arith.constant 82 : index
    %495 = vector.load %arg5[%c0_166, %c82_167] : memref<2x512xf32, #tpu.memory_space<vmem>>, vector<2x256xf32>
    %496 = vector.broadcast %494 : f32 to vector<2x256xf32>
    %497 = arith.mulf %496, %495 : vector<2x256xf32>
    %498 = arith.addf %493, %497 : vector<2x256xf32>
    %c61 = arith.constant 61 : index
    %499 = memref.load %arg2[%c61] : memref<98xf32, #tpu.memory_space<smem>>
    %c0_168 = arith.constant 0 : index
    %c98_169 = arith.constant 98 : index
    %500 = vector.load %arg5[%c0_168, %c98_169] : memref<2x512xf32, #tpu.memory_space<vmem>>, vector<2x256xf32>
    %501 = vector.broadcast %499 : f32 to vector<2x256xf32>
    %502 = arith.mulf %501, %500 : vector<2x256xf32>
    %503 = arith.addf %498, %502 : vector<2x256xf32>
    %c68 = arith.constant 68 : index
    %504 = memref.load %arg2[%c68] : memref<98xf32, #tpu.memory_space<smem>>
    %c0_170 = arith.constant 0 : index
    %c114_171 = arith.constant 114 : index
    %505 = vector.load %arg5[%c0_170, %c114_171] : memref<2x512xf32, #tpu.memory_space<vmem>>, vector<2x256xf32>
    %506 = vector.broadcast %504 : f32 to vector<2x256xf32>
    %507 = arith.mulf %506, %505 : vector<2x256xf32>
    %508 = arith.addf %503, %507 : vector<2x256xf32>
    %c75 = arith.constant 75 : index
    %509 = memref.load %arg2[%c75] : memref<98xf32, #tpu.memory_space<smem>>
    %c0_172 = arith.constant 0 : index
    %c130_173 = arith.constant 130 : index
    %510 = vector.load %arg5[%c0_172, %c130_173] : memref<2x512xf32, #tpu.memory_space<vmem>>, vector<2x256xf32>
    %511 = vector.broadcast %509 : f32 to vector<2x256xf32>
    %512 = arith.mulf %511, %510 : vector<2x256xf32>
    %513 = arith.addf %508, %512 : vector<2x256xf32>
    %c82_174 = arith.constant 82 : index
    %514 = memref.load %arg2[%c82_174] : memref<98xf32, #tpu.memory_space<smem>>
    %c0_175 = arith.constant 0 : index
    %c146_176 = arith.constant 146 : index
    %515 = vector.load %arg5[%c0_175, %c146_176] : memref<2x512xf32, #tpu.memory_space<vmem>>, vector<2x256xf32>
    %516 = vector.broadcast %514 : f32 to vector<2x256xf32>
    %517 = arith.mulf %516, %515 : vector<2x256xf32>
    %518 = arith.addf %513, %517 : vector<2x256xf32>
    %c89 = arith.constant 89 : index
    %519 = memref.load %arg2[%c89] : memref<98xf32, #tpu.memory_space<smem>>
    %c0_177 = arith.constant 0 : index
    %c162_178 = arith.constant 162 : index
    %520 = vector.load %arg5[%c0_177, %c162_178] : memref<2x512xf32, #tpu.memory_space<vmem>>, vector<2x256xf32>
    %521 = vector.broadcast %519 : f32 to vector<2x256xf32>
    %522 = arith.mulf %521, %520 : vector<2x256xf32>
    %523 = arith.addf %518, %522 : vector<2x256xf32>
    %c96_179 = arith.constant 96 : index
    %524 = memref.load %arg2[%c96_179] : memref<98xf32, #tpu.memory_space<smem>>
    %c0_180 = arith.constant 0 : index
    %c178_181 = arith.constant 178 : index
    %525 = vector.load %arg5[%c0_180, %c178_181] : memref<2x512xf32, #tpu.memory_space<vmem>>, vector<2x256xf32>
    %526 = vector.broadcast %524 : f32 to vector<2x256xf32>
    %527 = arith.mulf %526, %525 : vector<2x256xf32>
    %528 = arith.addf %523, %527 : vector<2x256xf32>
    %cst_182 = arith.constant 0.000000e+00 : f32
    %529 = vector.shape_cast %69 : vector<1x256xi1> to vector<1x256xi1>
    %530 = vector.broadcast %529 : vector<1x256xi1> to vector<2x256xi1>
    %531 = vector.broadcast %cst_182 : f32 to vector<2x256xf32>
    %532 = arith.select %530, %528, %531 : vector<2x256xi1>, vector<2x256xf32>
    %533 = arith.addf %457, %532 : vector<2x256xf32>
    %cst_183 = arith.constant 0.000000e+00 : f32
    %534 = vector.broadcast %cst_183 : f32 to vector<2x256xf32>
    %c6 = arith.constant 6 : index
    %535 = memref.load %arg2[%c6] : memref<98xf32, #tpu.memory_space<smem>>
    %c0_184 = arith.constant 0 : index
    %c83 = arith.constant 83 : index
    %536 = vector.load %arg4[%c0_184, %c83] : memref<2x512xf32, #tpu.memory_space<vmem>>, vector<2x256xf32>
    %537 = vector.broadcast %535 : f32 to vector<2x256xf32>
    %538 = arith.mulf %537, %536 : vector<2x256xf32>
    %539 = arith.addf %534, %538 : vector<2x256xf32>
    %c13 = arith.constant 13 : index
    %540 = memref.load %arg2[%c13] : memref<98xf32, #tpu.memory_space<smem>>
    %c0_185 = arith.constant 0 : index
    %c99 = arith.constant 99 : index
    %541 = vector.load %arg4[%c0_185, %c99] : memref<2x512xf32, #tpu.memory_space<vmem>>, vector<2x256xf32>
    %542 = vector.broadcast %540 : f32 to vector<2x256xf32>
    %543 = arith.mulf %542, %541 : vector<2x256xf32>
    %544 = arith.addf %539, %543 : vector<2x256xf32>
    %c20 = arith.constant 20 : index
    %545 = memref.load %arg2[%c20] : memref<98xf32, #tpu.memory_space<smem>>
    %c0_186 = arith.constant 0 : index
    %c115 = arith.constant 115 : index
    %546 = vector.load %arg4[%c0_186, %c115] : memref<2x512xf32, #tpu.memory_space<vmem>>, vector<2x256xf32>
    %547 = vector.broadcast %545 : f32 to vector<2x256xf32>
    %548 = arith.mulf %547, %546 : vector<2x256xf32>
    %549 = arith.addf %544, %548 : vector<2x256xf32>
    %c27 = arith.constant 27 : index
    %550 = memref.load %arg2[%c27] : memref<98xf32, #tpu.memory_space<smem>>
    %c0_187 = arith.constant 0 : index
    %c131 = arith.constant 131 : index
    %551 = vector.load %arg4[%c0_187, %c131] : memref<2x512xf32, #tpu.memory_space<vmem>>, vector<2x256xf32>
    %552 = vector.broadcast %550 : f32 to vector<2x256xf32>
    %553 = arith.mulf %552, %551 : vector<2x256xf32>
    %554 = arith.addf %549, %553 : vector<2x256xf32>
    %c34 = arith.constant 34 : index
    %555 = memref.load %arg2[%c34] : memref<98xf32, #tpu.memory_space<smem>>
    %c0_188 = arith.constant 0 : index
    %c147 = arith.constant 147 : index
    %556 = vector.load %arg4[%c0_188, %c147] : memref<2x512xf32, #tpu.memory_space<vmem>>, vector<2x256xf32>
    %557 = vector.broadcast %555 : f32 to vector<2x256xf32>
    %558 = arith.mulf %557, %556 : vector<2x256xf32>
    %559 = arith.addf %554, %558 : vector<2x256xf32>
    %c41 = arith.constant 41 : index
    %560 = memref.load %arg2[%c41] : memref<98xf32, #tpu.memory_space<smem>>
    %c0_189 = arith.constant 0 : index
    %c163 = arith.constant 163 : index
    %561 = vector.load %arg4[%c0_189, %c163] : memref<2x512xf32, #tpu.memory_space<vmem>>, vector<2x256xf32>
    %562 = vector.broadcast %560 : f32 to vector<2x256xf32>
    %563 = arith.mulf %562, %561 : vector<2x256xf32>
    %564 = arith.addf %559, %563 : vector<2x256xf32>
    %c48 = arith.constant 48 : index
    %565 = memref.load %arg2[%c48] : memref<98xf32, #tpu.memory_space<smem>>
    %c0_190 = arith.constant 0 : index
    %c179 = arith.constant 179 : index
    %566 = vector.load %arg4[%c0_190, %c179] : memref<2x512xf32, #tpu.memory_space<vmem>>, vector<2x256xf32>
    %567 = vector.broadcast %565 : f32 to vector<2x256xf32>
    %568 = arith.mulf %567, %566 : vector<2x256xf32>
    %569 = arith.addf %564, %568 : vector<2x256xf32>
    %c55 = arith.constant 55 : index
    %570 = memref.load %arg2[%c55] : memref<98xf32, #tpu.memory_space<smem>>
    %c0_191 = arith.constant 0 : index
    %c83_192 = arith.constant 83 : index
    %571 = vector.load %arg5[%c0_191, %c83_192] : memref<2x512xf32, #tpu.memory_space<vmem>>, vector<2x256xf32>
    %572 = vector.broadcast %570 : f32 to vector<2x256xf32>
    %573 = arith.mulf %572, %571 : vector<2x256xf32>
    %574 = arith.addf %569, %573 : vector<2x256xf32>
    %c62 = arith.constant 62 : index
    %575 = memref.load %arg2[%c62] : memref<98xf32, #tpu.memory_space<smem>>
    %c0_193 = arith.constant 0 : index
    %c99_194 = arith.constant 99 : index
    %576 = vector.load %arg5[%c0_193, %c99_194] : memref<2x512xf32, #tpu.memory_space<vmem>>, vector<2x256xf32>
    %577 = vector.broadcast %575 : f32 to vector<2x256xf32>
    %578 = arith.mulf %577, %576 : vector<2x256xf32>
    %579 = arith.addf %574, %578 : vector<2x256xf32>
    %c69 = arith.constant 69 : index
    %580 = memref.load %arg2[%c69] : memref<98xf32, #tpu.memory_space<smem>>
    %c0_195 = arith.constant 0 : index
    %c115_196 = arith.constant 115 : index
    %581 = vector.load %arg5[%c0_195, %c115_196] : memref<2x512xf32, #tpu.memory_space<vmem>>, vector<2x256xf32>
    %582 = vector.broadcast %580 : f32 to vector<2x256xf32>
    %583 = arith.mulf %582, %581 : vector<2x256xf32>
    %584 = arith.addf %579, %583 : vector<2x256xf32>
    %c76 = arith.constant 76 : index
    %585 = memref.load %arg2[%c76] : memref<98xf32, #tpu.memory_space<smem>>
    %c0_197 = arith.constant 0 : index
    %c131_198 = arith.constant 131 : index
    %586 = vector.load %arg5[%c0_197, %c131_198] : memref<2x512xf32, #tpu.memory_space<vmem>>, vector<2x256xf32>
    %587 = vector.broadcast %585 : f32 to vector<2x256xf32>
    %588 = arith.mulf %587, %586 : vector<2x256xf32>
    %589 = arith.addf %584, %588 : vector<2x256xf32>
    %c83_199 = arith.constant 83 : index
    %590 = memref.load %arg2[%c83_199] : memref<98xf32, #tpu.memory_space<smem>>
    %c0_200 = arith.constant 0 : index
    %c147_201 = arith.constant 147 : index
    %591 = vector.load %arg5[%c0_200, %c147_201] : memref<2x512xf32, #tpu.memory_space<vmem>>, vector<2x256xf32>
    %592 = vector.broadcast %590 : f32 to vector<2x256xf32>
    %593 = arith.mulf %592, %591 : vector<2x256xf32>
    %594 = arith.addf %589, %593 : vector<2x256xf32>
    %c90 = arith.constant 90 : index
    %595 = memref.load %arg2[%c90] : memref<98xf32, #tpu.memory_space<smem>>
    %c0_202 = arith.constant 0 : index
    %c163_203 = arith.constant 163 : index
    %596 = vector.load %arg5[%c0_202, %c163_203] : memref<2x512xf32, #tpu.memory_space<vmem>>, vector<2x256xf32>
    %597 = vector.broadcast %595 : f32 to vector<2x256xf32>
    %598 = arith.mulf %597, %596 : vector<2x256xf32>
    %599 = arith.addf %594, %598 : vector<2x256xf32>
    %c97_204 = arith.constant 97 : index
    %600 = memref.load %arg2[%c97_204] : memref<98xf32, #tpu.memory_space<smem>>
    %c0_205 = arith.constant 0 : index
    %c179_206 = arith.constant 179 : index
    %601 = vector.load %arg5[%c0_205, %c179_206] : memref<2x512xf32, #tpu.memory_space<vmem>>, vector<2x256xf32>
    %602 = vector.broadcast %600 : f32 to vector<2x256xf32>
    %603 = arith.mulf %602, %601 : vector<2x256xf32>
    %604 = arith.addf %599, %603 : vector<2x256xf32>
    %cst_207 = arith.constant 0.000000e+00 : f32
    %605 = vector.shape_cast %76 : vector<1x256xi1> to vector<1x256xi1>
    %606 = vector.broadcast %605 : vector<1x256xi1> to vector<2x256xi1>
    %607 = vector.broadcast %cst_207 : f32 to vector<2x256xf32>
    %608 = arith.select %606, %604, %607 : vector<2x256xi1>, vector<2x256xf32>
    %609 = arith.addf %533, %608 : vector<2x256xf32>
    %610 = arith.negf %609 : vector<2x256xf32>
    %611 = math.exp %610 : vector<2x256xf32>
    %cst_208 = arith.constant 1.000000e+00 : f32
    %612 = vector.broadcast %cst_208 : f32 to vector<2x256xf32>
    %613 = arith.addf %612, %611 : vector<2x256xf32>
    %614 = arith.divf %612, %613 : vector<2x256xf32>
    %615 = vector.shape_cast %614 : vector<2x256xf32> to vector<2x1x256xf32>
    %616 = vector.broadcast %615 : vector<2x1x256xf32> to vector<2x4x256xf32>
    %617 = arith.mulf %0, %616 : vector<2x4x256xf32>
    %c0_209 = arith.constant 0 : index
    %c0_210 = arith.constant 0 : index
    %c0_211 = arith.constant 0 : index
    %618 = vector.load %arg3[%c0_209, %c0_210, %c0_211] : memref<2x4x256xf32, #tpu.memory_space<vmem>>, vector<2x4x256xf32>
    tpu.vector_store %arg3[%c0_209, %c0_210, %c0_211], %617 {strides = array<i32>} : memref<2x4x256xf32, #tpu.memory_space<vmem>>, vector<2x4x256xf32>,
    return
  }
  func.func @transform_0(%arg0: i32) -> (i32, i32, i32) {
    %c0_i32 = arith.constant 0 : i32
    %c0_i32_0 = arith.constant 0 : i32
    %c0_i32_1 = arith.constant 0 : i32
    %c0_i32_2 = arith.constant 0 : i32
    return %c0_i32, %c0_i32_0, %c0_i32_1 : i32, i32, i32
  }
  func.func @transform_1(%arg0: i32) -> i32 {
    %c0_i32 = arith.constant 0 : i32
    %c0_i32_0 = arith.constant 0 : i32
    return %c0_i32 : i32
  }
  func.func @transform_2(%arg0: i32) -> (i32, i32, i32) {
    %c0_i32 = arith.constant 0 : i32
    %c0_i32_0 = arith.constant 0 : i32
    %c0_i32_1 = arith.constant 0 : i32
    %c0_i32_2 = arith.constant 0 : i32
    return %c0_i32, %c0_i32_0, %c0_i32_1 : i32, i32, i32
  }
}

</mosaic_0001>

<bundles_post_ra>
// kernel: tpu_custom_call.1
= control target key start
LH: loop header
LB: loop body
LE: loop exit
PB: predicated region body
PF: predicated region fallthrough
CT: control target
= control target key end

     0   :  { %7 = vsyncpa [#allocation5], 0  ;;  %s2402_s0 = inlined_call_operand.hbm [shape: f32[2,4,256], index: 0, kind: input, shape index: {}]   ;;  %s2403_s1 = inlined_call_operand.vmem [shape: f32[98], index: 1, kind: input, shape index: {}]   ;;  %s2404_s2 = inlined_call_operand.hbm [shape: f32[2,4,256], index: 2, kind: output, shape index: {}]  }
   0x1   :  { %8 = vsyncpa [#allocation7], 0 }
   0x2   :  { %9 = vsyncpa [#allocation6], 0  ;;  %s1711_s9 = smov [#allocation4]   ;;  %s28_s13 = sshll.u32 %s2403_s1, 4  ;;  %s29_s13 = int_to_ptr.vmem [resolvable:$true] %s28_s13 }
   0x3   :  { %s15_s10 = sshll.u32 %s1711_s9, 4  ;;  %s1649_s16 = scalar_lea.hbm %s2402_s0, 256  ;;  %s16_s10 = int_to_ptr.vmem [resolvable:$true] %s15_s10 }
   0x4   :  { %p1650_p0 = scmp.ne.s32.totalorder %s2402_s0, %s1649_s16  ;;  %p1653_p1 = scmp.lt.u32.totalorder %s1649_s16, %s2402_s0 }
   0x6   :  { %p1655_p2 = pnand %p1653_p1, %p1650_p0 }
   0x8   :  { %1658 = shalt.err (!%p1655_p2)
}
   0x9   :  { %s1659_s21 = scalar_lea.vmem %s16_s10, 256  ;;  %p1664_p4 = scmp.lt.s32.totalorder %s16_s10, %s16_s10 }
   0xa   :  { %p1660_p3 = scmp.ne.s32.totalorder %s16_s10, %s1659_s21  ;;  %p1665_p5 = scmp.lt.s32.totalorder %s1659_s21, %s1659_s21 }
   0xc   :  { %p1666_p6 = por %p1665_p5, %p1664_p4 }
   0xe   :  { %p1667_p7 = pnand %p1666_p6, %p1660_p3 }
  0x10   :  { %1670 = shalt.err (!%p1667_p7)
}
  0x11   :  { %s1712_s1 = smov 128   ;;  %s1713_s22 = smov 8  }
  0x12   :  { %21 = dma.hbm_to_vmem [thread:$0]  %s2402_s0, 256, %s16_s10, [#allocation5], %s1712_s1, %s1712_s1, %s1713_s22  }
  0x13   :  { %s1671_s25 = scalar_lea.vmem %s29_s13, 16  ;;  %p1676_p9 = scmp.lt.s32.totalorder %s29_s13, %s29_s13 }
  0x14   :  { %p1672_p8 = scmp.ne.s32.totalorder %s29_s13, %s1671_s25  ;;  %p1677_p10 = scmp.lt.s32.totalorder %s1671_s25, %s1671_s25 }
  0x16   :  { %p1678_p11 = por %p1677_p10, %p1676_p9 }
  0x18   :  { %p1679_p12 = pnand %p1678_p11, %p1672_p8 }
  0x1a   :  { %1682 = shalt.err (!%p1679_p12)
}
  0x1b   :  { %s1714_s26 = smov [#allocation8]  }
  0x1c   :  { %31 = dma.vmem_to_smem %s29_s13, 16, %s1714_s26, [#allocation7]  }
  0x1d   :  { %1705 = dma.done.wait [#allocation5], 256  }
  0x1e   :  { %1706 = vsyncadd [#allocation5], 4294967040 }
  0x1f   :  { %1707 = dma.done.wait [#allocation7], 16  }
  0x20   :  { %1708 = vsyncadd [#allocation7], 4294967280 }
  0x21   :  { %38 = sfence }
  0x22   :  { %v39_v0 = vld [vmem:[#allocation4] sm:$0xff]  ;;  %v40_v1 = vld [vmem:[#allocation4 + $0x8] sm:$0xff]  ;;  %vm47_vm0 = vcmask 1043456   ;;  %v1715_v6 = vmov 0.0   ;;  %v1716_v19 = vmov 1983009808   ;;  %v119_v21 = vlaneseq }
  0x23   :  { %v43_v2 = vcombine.high %v39_v0, %v39_v0  ;;  %v44_v3 = vcombine.high %v40_v1, %v40_v1  ;;  %v48_v4 = vsel %vm47_vm0, %v39_v0, 0.0  ;;  %v62_v5 = vsel %vm47_vm0, %v40_v1, 0.0  ;;  %109 = vst [vmem:[#allocation2] sm:$0xff] %v1715_v6  ;;  %110 = vst [vmem:[#allocation3] sm:$0xff] %v1715_v6  ;;  %s1520_s0 = sld [smem:[#allocation8 + $0x15]]  ;;  %s1518_s27 = sld [smem:[#allocation8 + $0x7]] }
  0x24   :  { %v49_v7 = vrot.slane %v48_v4, 4  ;;  %v63_v8 = vrot.slane %v62_v5, 4  ;;  %v117_v20 = vunpack.c.l.s4 %v1716_v19  ;;  %v1769_v31 = vshrl.u32 %v119_v21, 7  ;;  %s1784_s28 = sld [smem:[#allocation8 + $0x8]]  ;;  %s1519_s29 = sld [smem:[#allocation8 + $0xe]] }
  0x25   :  { %v55_v9 = vsel %vm47_vm0, %v43_v2, 0.0  ;;  %v69_v10 = vsel %vm47_vm0, %v44_v3, 0.0  ;;  %v81_v43 = vsel %vm47_vm0, %v39_v0, -inf  ;;  %v88_v44 = vsel %vm47_vm0, %v43_v2, -inf  ;;  %s1786_s30 = sld [smem:[#allocation8 + $0x9]]  ;;  %s1788_s3 = sld [smem:[#allocation8 + $0xf]] }
  0x26   :  { %v50_v11 = vadd.f32 %v49_v7, %v48_v4  ;;  %v56_v12 = vrot.slane %v55_v9, 4  ;;  %v64_v13 = vadd.f32 %v63_v8, %v62_v5  ;;  %v70_v14 = vrot.slane %v69_v10, 4  ;;  %s1790_s4 = sld [smem:[#allocation8 + $0x10]]  ;;  %s1792_s5 = sld [smem:[#allocation8 + $0x16]] }
  0x27   :  { %v118_v30 = vunpack.c.0.s8 %v117_v20  ;;  %v82_v47 = vrot.slane %v81_v43, 4  ;;  %v95_v48 = vsel %vm47_vm0, %v40_v1, -inf  ;;  %v89_v51 = vrot.slane %v88_v44, 4  ;;  %s1717_s6 = smov 80   ;;  %s1718_s7 = smov 112  }
  0x28   :  { %v51_v15 = vrot.slane %v50_v11, 2  ;;  %v57_v16 = vadd.f32 %v56_v12, %v55_v9  ;;  %v65_v17 = vrot.slane %v64_v13, 2  ;;  %v71_v18 = vadd.f32 %v70_v14, %v69_v10  ;;  %s1809_s8 = sld [smem:[#allocation8 + $0x1c]]  ;;  %s1811_s9 = sld [smem:[#allocation8 + $0xa]] }
  0x29   :  { %v1772_v42 = vsub.s32 %v118_v30, %v1769_v31  ;;  %vm136_vm1 = vcmask 1041409   ;;  %vm138_vm2 = vcmask 1043459   ;;  %v96_v53 = vrot.slane %v95_v48, 4  ;;  %s1719_s10 = smov 96   ;;  %s1819_s11 = sld [smem:[#allocation8 + $0x17]] }
  0x2a   :  { %v52_v22 = vadd.f32 %v51_v15, %v50_v11  ;;  %v58_v23 = vrot.slane %v57_v16, 2  ;;  %v66_v24 = vadd.f32 %v65_v17, %v64_v13  ;;  %v72_v25 = vrot.slane %v71_v18, 2  ;;  %s1821_s12 = sld [smem:[#allocation8 + $0x1d]]  ;;  %s1827_s13 = sld [smem:[#allocation8 + $0x11]] }
  0x2b   :  { %vm140_vm3 = vcmask 1045509   ;;  %v83_v54 = vmax.f32 %v81_v43, %v82_v47  ;;  %v102_v55 = vsel %vm47_vm0, %v44_v3, -inf  ;;  %vm142_vm4 = vcmask 1047559   ;;  %s1835_s14 = sld [smem:[#allocation8 + $0xb]]  ;;  %s1536_s15 = sld [smem:[#allocation8 + $0x24]] }
  0x2c   :  { %v53_v26 = vrot.slane %v52_v22, 1  ;;  %v59_v27 = vadd.f32 %v58_v23, %v57_v16  ;;  %v67_v28 = vrot.slane %v66_v24, 1  ;;  %v73_v29 = vadd.f32 %v72_v25, %v71_v18  ;;  %s1522_s16 = sld [smem:[#allocation8 + $0x23]]  ;;  %s1720_s17 = smov 64  }
  0x2d   :  { %v90_v57 = vmax.f32 %v88_v44, %v89_v51  ;;  %v97_v60 = vmax.f32 %v95_v48, %v96_v53  ;;  %v103_v61 = vrot.slane %v102_v55, 4  ;;  %v84_v63 = vrot.slane %v83_v54, 2  ;;  %s1575_s18 = sld [smem:[#allocation8 + $0x12]]  ;;  %s1549_s19 = sld [smem:[#allocation8 + $0x1e]] }
  0x2e   :  { %v54_v32 = vadd.f32 %v53_v26, %v52_v22  ;;  %v60_v33 = vrot.slane %v59_v27, 1  ;;  %v68_v34 = vadd.f32 %v67_v28, %v66_v24  ;;  %v74_v35 = vrot.slane %v73_v29, 1  ;;  %s1562_s20 = sld [smem:[#allocation8 + $0x18]]  ;;  %s1588_s21 = sld [smem:[#allocation8 + $0xc]] }
  0x2f   :  { %v91_v0 = vrot.slane %v90_v57, 2  ;;  %v104_v1 = vmax.f32 %v102_v55, %v103_v61  ;;  %v98_v2 = vrot.slane %v97_v60, 2  ;;  %v85_v3 = vmax.f32 %v83_v54, %v84_v63  ;;  %s1537_s23 = sld [smem:[#allocation8 + $0x2b]]  ;;  %s1523_s24 = sld [smem:[#allocation8 + $0x2a]] }
  0x30   :  { %v61_v36 = vadd.f32 %v60_v33, %v59_v27  ;;  %v75_v37 = vadd.f32 %v74_v35, %v73_v29  ;;  %v77_v38 = vmul.f32 0.25, %v54_v32  ;;  %v79_v39 = vmul.f32 0.25, %v68_v34  ;;  %s1721_s25 = smov 48   ;;  %s1576_s26 = sld [smem:[#allocation8 + $0x19]] }
  0x31   :  { %v92_v4 = vmax.f32 %v90_v57, %v91_v0  ;;  %v105_v5 = vrot.slane %v104_v1, 2  ;;  %v284_v6 = vstv %s1520_s0  ;;  %v262_v7 = vstv %s1518_s27  ;;  %s1550_s0 = sld [smem:[#allocation8 + $0x25]] }
  0x32   :  { %v78_v40 = vmul.f32 0.25, %v61_v36  ;;  %v80_v41 = vmul.f32 0.25, %v75_v37  ;;  %v99_v8 = vmax.f32 %v97_v60, %v98_v2  ;;  %v436_v11 = vstv %s1784_s28  ;;  %s1602_s27 = sld [smem:[#allocation8 + $0xd]]  ;;  %s1589_s28 = sld [smem:[#allocation8 + $0x13]] }
  0x33   :  { %v273_v12 = vstv %s1519_s29  ;;  %v86_v13 = vrot.slane %v85_v3, 1  ;;  %v93_v16 = vrot.slane %v92_v4, 1  ;;  %v106_v17 = vmax.f32 %v104_v1, %v105_v5  ;;  %s1551_s29 = sld [smem:[#allocation8 + $0x2c]] }
  0x34   :  { %v115_v45 = vcombine.low %v77_v38, %v78_v40  ;;  %v123_v46 = vcombine.low %v79_v39, %v80_v41  ;;  %v100_v20 = vrot.slane %v99_v8, 1  ;;  %v604_v23 = vstv %s1786_s30  ;;  %s1563_s30 = sld [smem:[#allocation8 + $0x1f]] }
  0x35   :  { %v446_v24 = vstv %s1788_s3  ;;  %v87_v25 = vmax.f32 %v85_v3, %v86_v13  ;;  %v94_v26 = vmax.f32 %v92_v4, %v93_v16  ;;  %v107_v27 = vrot.slane %v106_v17, 1  ;;  %s1722_s3 = smov 32  }
  0x36   :  { %v122_v49 = vrot.slane %v115_v45, %v1772_v42  ;;  %v130_v50 = vrot.slane %v123_v46, %v1772_v42  ;;  %v101_v30 = vmax.f32 %v99_v8, %v100_v20  ;;  %v614_v32 = vstv %s1790_s4  ;;  %s1590_s4 = sld [smem:[#allocation8 + $0x1a]] }
  0x37   :  { %v456_v33 = vstv %s1792_s5  ;;  %v108_v34 = vmax.f32 %v106_v17, %v107_v27  ;;  %v150_v35 = vcombine.low %v87_v25, %v94_v26  ;;  %v296_v40 = vstv %s1809_s8  ;;  %s1577_s5 = sld [smem:[#allocation8 + $0x20]]  ;;  %s1564_s8 = sld [smem:[#allocation8 + $0x26]] }
  0x38   :  { %v135_v52 = vrot.slane %v130_v50, 7  ;;  %v772_v43 = vstv %s1811_s9  ;;  %v467_v51 = vstv %s1821_s12  ;;  %v782_v57 = vstv %s1827_s13  ;;  %s1603_s9 = sld [smem:[#allocation8 + $0x14]]  ;;  %s1525_s12 = sld [smem:[#allocation8 + $0x38]] }
  0x39   :  { %v158_v38 = vcombine.low %v101_v30, %v108_v34  ;;  %v157_v44 = vrot.slane %v150_v35, %v1772_v42  ;;  %v477_v63 = vstv %s1536_s15  ;;  %v307_v0 = vstv %s1522_s16  ;;  %s1591_s13 = sld [smem:[#allocation8 + $0x21]]  ;;  %s1565_s15 = sld [smem:[#allocation8 + $0x2d]] }
  0x3a   :  { %v137_v56 = vsel %vm136_vm1, %v135_v52, %v122_v49  ;;  %v624_v49 = vstv %s1819_s11  ;;  %v951_v3 = vstv %s1575_s18  ;;  %v635_v5 = vstv %s1549_s19  ;;  %s1539_s11 = sld [smem:[#allocation8 + $0x39]]  ;;  %s1604_s16 = sld [smem:[#allocation8 + $0x1b]] }
  0x3b   :  { %v139_v58 = vsel %vm138_vm2, %v135_v52, %v137_v56  ;;  %v165_v45 = vrot.slane %v158_v38, %v1772_v42  ;;  %v1109_v13 = vstv %s1588_s21  ;;  %v487_v16 = vstv %s1537_s23  ;;  %s1540_s18 = sld [smem:[#allocation8 + $0x40]]  ;;  %s1526_s19 = sld [smem:[#allocation8 + $0x3f]] }
  0x3c   :  { %v141_v59 = vsel %vm140_vm3, %v135_v52, %v139_v58  ;;  %v318_v17 = vstv %s1523_s24  ;;  %v804_v35 = vstv %s1563_s30  ;;  %s1553_s21 = sld [smem:[#allocation8 + $0x3a]]  ;;  %s1592_s24 = sld [smem:[#allocation8 + $0x28]]  ;;  %vm268_vm5 = vcmask 916480  }
  0x3d   :  { %v143_v62 = vsel %vm142_vm4, %v135_v52, %v141_v59  ;;  %v168_v48 = vrot.slane %v165_v45, 7  ;;  %v941_v59 = vstv %s1835_s14  ;;  %v814_v45 = vstv %s1564_s8  ;;  %s1578_s14 = sld [smem:[#allocation8 + $0x27]]  ;;  %s1605_s23 = sld [smem:[#allocation8 + $0x22]] }
  0x3e   :  { %145 = vst [vmem:[#allocation2 + $0x2] sm:$0xf] %v143_v62  ;;  %s1606_s30 = sld [smem:[#allocation8 + $0x29]]  ;;  %s1581_s8 = sld [smem:[#allocation8 + $0x3c]]  ;;  %vm279_vm6 = vcmask 785408   ;;  %vm290_vm7 = vcmask 654336  }
  0x3f   :  { %v169_v52 = vsel %vm136_vm1, %v168_v48, %v157_v44  ;;  %vm302_vm8 = vcmask 523264   ;;  %vm313_vm9 = vcmask 392192   ;;  %vm324_vm10 = vcmask 261120  }
  0x40   :  { %v170_v53 = vsel %vm138_vm2, %v168_v48, %v169_v52  ;;  %v334_v52 = vstv %s1525_s12  ;;  %s1607_s12 = sld [smem:[#allocation8 + $0x30]]  ;;  %vm421_vm11 = vcmask 416768   ;;  %vm589_vm12 = vcmask 408576  }
  0x41   :  { %v171_v56 = vsel %vm140_vm3, %v168_v48, %v170_v53  ;;  %vm757_vm13 = vcmask 400384  }
  0x42   :  { %v172_v60 = vsel %vm142_vm4, %v168_v48, %v171_v56  ;;  %vm1094_vm4 = vcmask 384000  }
  0x43   :  { %174 = vst [vmem:[#allocation3 + $0x2] sm:$0xf] %v172_v60  ;;  %v982_v56 = vstv %s1578_s14  ;;  %v824_v60 = vstv %s1565_s15  ;;  %s1529_s14 = sld [smem:[#allocation8 + $0x54]]  ;;  %s1582_s15 = sld [smem:[#allocation8 + $0x43]] }
  0x45   :  { %v1794_v9 = vld [vmem:[#allocation2] sm:$0x3f] }
  0x46   :  { %v1796_v10 = vld [vmem:[#allocation2] sm:$0x3f]  ;;  %v285_v14 = vmul.f32 %v284_v6, %v1794_v9  ;;  %v263_v15 = vmul.f32 %v262_v7, %v1794_v9  ;;  %v274_v19 = vmul.f32 %v273_v12, %v1794_v9 }
  0x47   :  { %v437_v18 = vmul.f32 %v436_v11, %v1796_v10  ;;  %v1805_v22 = vld [vmem:[#allocation2] sm:$0x3f]  ;;  %v447_v29 = vmul.f32 %v446_v24, %v1796_v10  ;;  %v457_v37 = vmul.f32 %v456_v33, %v1796_v10  ;;  %v793_v11 = vstv %s1562_s20  ;;  %s1579_s20 = sld [smem:[#allocation8 + $0x2e]] }
  0x48   :  { %287 = vrot.lane.b32.xlu1 %v285_v14, %s1717_s6  ;;  %265 = vrot.lane.b32.xlu0 %v263_v15, %s1718_s7  ;;  %v605_v28 = vmul.f32 %v604_v23, %v1805_v22  ;;  %v615_v36 = vmul.f32 %v614_v32, %v1805_v22  ;;  %v1829_v39 = vld [vmem:[#allocation2 + $0x2] sm:$0x3f]  ;;  %v625_v54 = vmul.f32 %v624_v49, %v1805_v22  ;;  %v962_v23 = vstv %s1576_s26  ;;  %s1541_s26 = sld [smem:[#allocation8 + $0x47]] }
  0x49   :  { %v1832_v41 = vld [vmem:[#allocation2] sm:$0x3f]  ;;  %v297_v46 = vmul.f32 %v296_v40, %v1829_v39  ;;  %v308_v2 = vmul.f32 %v307_v0, %v1829_v39  ;;  %v645_v24 = vstv %s1550_s0  ;;  %v655_v33 = vstv %s1551_s29  ;;  %s1527_s0 = sld [smem:[#allocation8 + $0x46]]  ;;  %s1567_s29 = sld [smem:[#allocation8 + $0x3b]] }
  0x4a   :  { %v773_v47 = vmul.f32 %v772_v43, %v1832_v41  ;;  %v466_v50 = vld [vmem:[#allocation2 + $0x2] sm:$0x3f]  ;;  %v783_v61 = vmul.f32 %v782_v57, %v1832_v41  ;;  %v972_v40 = vstv %s1577_s5  ;;  %v1896_v49 = vld [vmem:[#allocation3] sm:$0x3f]  ;;  %s1528_s5 = sld [smem:[#allocation8 + $0x4d]] }
  0x4b   :  { %v468_v55 = vmul.f32 %v467_v51, %v466_v50  ;;  %v1852_v58 = vld [vmem:[#allocation2] sm:$0x3f]  ;;  %v478_v1 = vmul.f32 %v477_v63, %v466_v50  ;;  %v1898_v51 = vld [vmem:[#allocation3] sm:$0x3f] }
  0x4c   :  { %439 = vrot.lane.b32.xlu1 %v437_v18, %s1718_s7  ;;  %276 = vrot.lane.b32.xlu0 %v274_v19, %s1719_s10  ;;  %v942_v62 = vmul.f32 %v941_v59, %v1852_v58  ;;  %v634_v4 = vld [vmem:[#allocation2 + $0x2] sm:$0x3f]  ;;  %v952_v6 = vmul.f32 %v951_v3, %v1852_v58  ;;  %v488_v18 = vmul.f32 %v487_v16, %v466_v50  ;;  %v502_v50 = vstv %s1539_s11  ;;  %s1568_s11 = sld [smem:[#allocation8 + $0x42]] }
  0x4d   :  { %v636_v7 = vmul.f32 %v635_v5, %v634_v4  ;;  %v792_v8 = vld [vmem:[#allocation2 + $0x2] sm:$0xf]  ;;  %v319_v19 = vmul.f32 %v318_v17, %v1829_v39  ;;  %v646_v26 = vmul.f32 %v645_v24, %v634_v4  ;;  %v1130_v39 = vstv %s1590_s4  ;;  %s1542_s4 = sld [smem:[#allocation8 + $0x4e]] }
  0x4e   :  { %v1866_v12 = vld [vmem:[#allocation2] sm:$0x3f]  ;;  %v794_v14 = vmul.f32 %v793_v11, %v792_v8  ;;  %v503_v53 = vmul.f32 %v502_v50, %v1896_v49  ;;  %v992_v5 = vstv %s1579_s20  ;;  %v522_v17 = vstv %s1541_s26  ;;  %s1963_s20 = sld [smem:[#allocation8]]  ;;  %s1977_s26 = sld [smem:[#allocation8 + $0x4a]] }
  0x4f   :  { %v1110_v15 = vmul.f32 %v1109_v13, %v1866_v12  ;;  %v1874_v20 = vld [vmem:[#allocation2 + $0x2] sm:$0x3f]  ;;  %v1308_v13 = vstv %s1605_s23  ;;  %s1969_s23 = sld [smem:[#allocation8 + $0x5b]] }
  0x50   :  { %607 = vrot.lane.b32.xlu1 %v605_v28, %s1718_s7  ;;  %449 = vrot.lane.b32.xlu0 %v447_v29, %s1719_s10  ;;  %v963_v25 = vmul.f32 %v962_v23, %v1874_v20  ;;  %v1879_v27 = vld [vmem:[#allocation2] sm:$0x3f]  ;;  %v1277_v28 = vstv %s1602_s27  ;;  %v1119_v29 = vstv %s1589_s28  ;;  %v973_v44 = vmul.f32 %v972_v40, %v1874_v20  ;;  %s1593_s27 = sld [smem:[#allocation8 + $0x2f]]  ;;  %s1554_s28 = sld [smem:[#allocation8 + $0x41]]  ;;  %v1949_v40 = vld [vmem:[#allocation3] sm:$0x3f] }
  0x51   :  { %v1278_v30 = vmul.f32 %v1277_v28, %v1879_v27  ;;  %v1120_v32 = vmul.f32 %v1119_v29, %v1866_v12  ;;  %v803_v34 = vld [vmem:[#allocation2 + $0x2] sm:$0x3f]  ;;  %v983_v59 = vmul.f32 %v982_v56, %v1874_v20  ;;  %v993_v8 = vmul.f32 %v992_v5, %v1874_v20  ;;  %v1935_v28 = vld [vmem:[#allocation3] sm:$0x3f] }
  0x52   :  { %v1887_v38 = vld [vmem:[#allocation2 + $0x2] sm:$0x3f]  ;;  %v825_v63 = vmul.f32 %v824_v60, %v803_v34  ;;  %v839_v29 = vstv %s1567_s29  ;;  %s1995_s29 = sld [smem:[#allocation8 + $0x44]] }
  0x53   :  { %v1131_v43 = vmul.f32 %v1130_v39, %v1887_v38 }
  0x54   :  { %617 = vrot.lane.b32.xlu1 %v615_v36, %s1719_s10  ;;  %459 = vrot.lane.b32.xlu0 %v457_v37, %s1717_s6  ;;  %v656_v36 = vmul.f32 %v655_v33, %v634_v4  ;;  %v805_v37 = vmul.f32 %v804_v35, %v803_v34  ;;  %v533_v35 = vstv %s1542_s4  ;;  %s1999_s4 = sld [smem:[#allocation8 + $0x5d]] }
  0x56   :  { %v1160_v23 = vstv %s1593_s27  ;;  %v680_v24 = vstv %s1554_s28  ;;  %s1985_s27 = sld [smem:[#allocation8 + $0x1]]  ;;  %s1990_s28 = sld [smem:[#allocation8 + $0x3e]] }
  0x58   :  { %299 = vrot.lane.b32.xlu1 %v297_v46, %s1720_s17  ;;  %775 = vrot.lane.b32.xlu0 %v773_v47, %s1718_s7  ;;  %v1287_v46 = vstv %s1603_s9  ;;  %v815_v47 = vmul.f32 %v814_v45, %v803_v34  ;;  %s1555_s9 = sld [smem:[#allocation8 + $0x48]]  ;;  %v1941_v34 = vld [vmem:[#allocation3 + $0x2] sm:$0x3f] }
  0x59   :  { %v1288_v48 = vmul.f32 %v1287_v46, %v1879_v27 }
  0x5c   :  { %627 = vrot.lane.b32.xlu1 %v625_v54, %s1717_s6  ;;  %470 = vrot.lane.b32.xlu0 %v468_v55, %s1720_s17  ;;  %v335_v54 = vmul.f32 %v334_v52, %v1898_v51  ;;  %v1140_v55 = vstv %s1591_s13  ;;  %s1543_s13 = sld [smem:[#allocation8 + $0x55]] }
  0x5d   :  { %v1141_v57 = vmul.f32 %v1140_v55, %v1887_v38 }
  0x60   :  { %785 = vrot.lane.b32.xlu1 %v783_v61, %s1719_s10  ;;  %944 = vrot.lane.b32.xlu0 %v942_v62, %s1718_s7  ;;  %v1908_v61 = vld [vmem:[#allocation2 + $0x2] sm:$0x3f]  ;;  %v1298_v62 = vstv %s1604_s16  ;;  %s1556_s16 = sld [smem:[#allocation8 + $0x4f]] }
  0x61   :  { %v1299_v0 = vmul.f32 %v1298_v62, %v1908_v61 }
  0x64   :  { %480 = vrot.lane.b32.xlu1 %v478_v1, %s1721_s25  ;;  %310 = vrot.lane.b32.xlu0 %v308_v2, %s1721_s25  ;;  %v512_v1 = vstv %s1540_s18  ;;  %v344_v2 = vstv %s1526_s19  ;;  %s1569_s18 = sld [smem:[#allocation8 + $0x49]]  ;;  %s1595_s19 = sld [smem:[#allocation8 + $0x3d]] }
  0x65   :  { %v513_v3 = vmul.f32 %v512_v1, %v1896_v49  ;;  %v345_v4 = vmul.f32 %v344_v2, %v1898_v51  ;;  %v1979_v1 = vld [vmem:[#allocation3] sm:$0x3f] }
  0x66   :  { %v701_v60 = vstv %s1556_s16  ;;  %s2079_s16 = sld [smem:[#allocation8 + $0x4c]] }
  0x68   :  { %954 = vrot.lane.b32.xlu1 %v952_v6, %s1719_s10  ;;  %638 = vrot.lane.b32.xlu0 %v636_v7, %s1720_s17  ;;  %v1917_v6 = vld [vmem:[#allocation3] sm:$0x3f]  ;;  %v670_v7 = vstv %s1553_s21  ;;  %s1967_s21 = sld [smem:[#allocation8 + $0x5c]] }
  0x69   :  { %v671_v11 = vmul.f32 %v670_v7, %v1917_v6 }
  0x6a   :  { %v1175_v2 = vstv %s1595_s19  ;;  %s2092_s19 = sld [smem:[#allocation8 + $0x59]] }
  0x6b   :  { %v1176_v7 = vmul.f32 %v1175_v2, %v1979_v1 }
  0x6c   :  { %796 = vrot.lane.b32.xlu1 %v794_v14, %s1717_s6  ;;  %1112 = vrot.lane.b32.xlu0 %v1110_v15, %s1718_s7  ;;  %v1150_v14 = vstv %s1592_s24  ;;  %v1309_v15 = vmul.f32 %v1308_v13, %v1908_v61  ;;  %s1975_s24 = sld [smem:[#allocation8 + $0x2]] }
  0x6d   :  { %v1151_v16 = vmul.f32 %v1150_v14, %v1887_v38  ;;  %v385_v14 = vstv %s1969_s23  ;;  %s2102_s23 = sld [smem:[#allocation8 + $0x53]] }
  0x6e   :  { %v553_v13 = vstv %s1967_s21  ;;  %s2100_s21 = sld [smem:[#allocation8 + $0x60]] }
  0x70   :  { %490 = vrot.lane.b32.xlu1 %v488_v18, %s1722_s3  ;;  %321 = vrot.lane.b32.xlu0 %v319_v19, %s1722_s3  ;;  %v354_v18 = vstv %s1527_s0  ;;  %v523_v19 = vmul.f32 %v522_v17, %v1896_v49  ;;  %s1981_s0 = sld [smem:[#allocation8 + $0x56]] }
  0x71   :  { %v355_v20 = vmul.f32 %v354_v18, %v1898_v51 }
  0x72   :  { %v600_v18 = vstv %s1975_s24  ;;  %s2110_s24 = sld [smem:[#allocation8 + $0x32]] }
  0x74   :  { %965 = vrot.lane.b32.xlu1 %v963_v25, %s1717_s6  ;;  %648 = vrot.lane.b32.xlu0 %v646_v26, %s1721_s25  ;;  %v1161_v25 = vmul.f32 %v1160_v23, %v1887_v38  ;;  %v681_v26 = vmul.f32 %v680_v24, %v1917_v6  ;;  %v534_v38 = vmul.f32 %v533_v35, %v1941_v34 }
  0x78   :  { %1280 = vrot.lane.b32.xlu1 %v1278_v30, %s1718_s7  ;;  %1122 = vrot.lane.b32.xlu0 %v1120_v32, %s1719_s10  ;;  %v1318_v30 = vstv %s1606_s30  ;;  %v840_v32 = vmul.f32 %v839_v29, %v1935_v28  ;;  %s1997_s30 = sld [smem:[#allocation8 + $0x3]]  ;;  %v711_v29 = vstv %s1981_s0  ;;  %s2125_s0 = sld [smem:[#allocation8 + $0x61]] }
  0x79   :  { %v1319_v33 = vmul.f32 %v1318_v30, %v1908_v61 }
  0x7c   :  { %658 = vrot.lane.b32.xlu1 %v656_v36, %s1722_s3  ;;  %807 = vrot.lane.b32.xlu0 %v805_v37, %s1720_s17  ;;  %v1943_v36 = vld [vmem:[#allocation3 + $0x2] sm:$0x3f]  ;;  %v365_v37 = vstv %s1528_s5  ;;  %s2012_s5 = sld [smem:[#allocation8 + $0x50]] }
  0x7d   :  { %v366_v39 = vmul.f32 %v365_v37, %v1943_v36 }
  0x80   :  { %1133 = vrot.lane.b32.xlu1 %v1131_v43, %s1717_s6  ;;  %975 = vrot.lane.b32.xlu0 %v973_v44, %s1720_s17  ;;  %v1007_v43 = vstv %s1581_s8  ;;  %v690_v44 = vstv %s1555_s9  ;;  %s2023_s8 = sld [smem:[#allocation8 + $0x4b]]  ;;  %s2028_s9 = sld [smem:[#allocation8 + $0x51]] }
  0x81   :  { %v1008_v45 = vmul.f32 %v1007_v43, %v1949_v40  ;;  %v691_v46 = vmul.f32 %v690_v44, %v1917_v6 }
  0x82   :  { %v871_v2 = vstv %s2012_s5  ;;  %s1725_s5 = smov 49  }
  0x84   :  { %817 = vrot.lane.b32.xlu1 %v815_v47, %s1721_s25  ;;  %1290 = vrot.lane.b32.xlu0 %v1288_v48, %s1719_s10  ;;  %v849_v47 = vstv %s1568_s11  ;;  %v1328_v48 = vstv %s1607_s12  ;;  %s2035_s11 = sld [smem:[#allocation8 + $0x4]]  ;;  %s2040_s12 = sld [smem:[#allocation8 + $0x57]] }
  0x85   :  { %v850_v50 = vmul.f32 %v849_v47, %v1935_v28  ;;  %v1329_v52 = vmul.f32 %v1328_v48, %v1908_v61 }
  0x88   :  { %505 = vrot.lane.b32.xlu1 %v503_v53, %s1718_s7  ;;  %337 = vrot.lane.b32.xlu0 %v335_v54, %s1718_s7  ;;  %v543_v53 = vstv %s1543_s13  ;;  %v375_v54 = vstv %s1529_s14  ;;  %s2047_s13 = sld [smem:[#allocation8 + $0x45]]  ;;  %s2064_s14 = sld [smem:[#allocation8 + $0x52]] }
  0x89   :  { %v544_v55 = vmul.f32 %v543_v53, %v1941_v34  ;;  %v376_v56 = vmul.f32 %v375_v54, %v1943_v36 }
  0x8c   :  { %1143 = vrot.lane.b32.xlu1 %v1141_v57, %s1720_s17  ;;  %985 = vrot.lane.b32.xlu0 %v983_v59, %s1721_s25  ;;  %v1017_v57 = vstv %s1582_s15  ;;  %v1965_v59 = vld [vmem:[#allocation3 + $0x2] sm:$0x3f]  ;;  %s2066_s15 = sld [smem:[#allocation8 + $0x58]] }
  0x8d   :  { %v1018_v61 = vmul.f32 %v1017_v57, %v1949_v40  ;;  %v702_v62 = vmul.f32 %v701_v60, %v1965_v59  ;;  %v712_v37 = vmul.f32 %v711_v29, %v1965_v59 }
  0x90   :  { %827 = vrot.lane.b32.xlu1 %v825_v63, %s1722_s3  ;;  %1301 = vrot.lane.b32.xlu0 %v1299_v0, %s1717_s6  ;;  %v859_v63 = vld [vmem:[#allocation3 + $0x2] sm:$0xf]  ;;  %v860_v0 = vstv %s1569_s18  ;;  %s2082_s18 = sld [smem:[#allocation8 + $0x5]] }
  0x91   :  { %v861_v5 = vmul.f32 %v860_v0, %v859_v63  ;;  %v2044_v0 = vld [vmem:[#allocation3 + $0x2] sm:$0x3f] }
  0x94   :  { %515 = vrot.lane.b32.xlu1 %v513_v3, %s1719_s10  ;;  %347 = vrot.lane.b32.xlu0 %v345_v4, %s1719_s10 }
  0x98   :  { %995 = vrot.lane.b32.xlu1 %v993_v8, %s1722_s3  ;;  %673 = vrot.lane.b32.xlu0 %v671_v11, %s1718_s7  ;;  %v258_v8 = vstv %s1963_s20  ;;  %s2094_s20 = sld [smem:[#allocation8 + $0x5f]] }
  0x99   :  { %v259_v17 = vmul.f32 %v258_v8, %v1794_v9 }
  0x9c   :  { %1311 = vrot.lane.b32.xlu1 %v1309_v15, %s1720_s17  ;;  %1153 = vrot.lane.b32.xlu0 %v1151_v16, %s1721_s25 }
  0xa0   :  { %525 = vrot.lane.b32.xlu1 %v523_v19, %s1717_s6  ;;  %357 = vrot.lane.b32.xlu0 %v355_v20, %s1717_s6  ;;  %v554_v19 = vmul.f32 %v553_v13, %v1941_v34  ;;  %v386_v20 = vmul.f32 %v385_v14, %v1943_v36 }
  0xa4   :  { %1163 = vrot.lane.b32.xlu1 %v1161_v25, %s1722_s3  ;;  %683 = vrot.lane.b32.xlu0 %v681_v26, %s1719_s10  ;;  %v2008_v25 = vld [vmem:[#allocation3 + $0x2] sm:$0x3f]  ;;  %v1028_v26 = vstv %s1977_s26  ;;  %s2119_s26 = sld [smem:[#allocation8 + $0x5a]] }
  0xa5   :  { %v1029_v36 = vmul.f32 %v1028_v26, %v2008_v25 }
  0xa8   :  { %842 = vrot.lane.b32.xlu1 %v840_v32, %s1718_s7  ;;  %1321 = vrot.lane.b32.xlu0 %v1319_v33, %s1721_s25  ;;  %v432_v32 = vstv %s1985_s27  ;;  %v601_v33 = vmul.f32 %v600_v18, %v1805_v22  ;;  %s2128_s27 = sld [smem:[#allocation8 + $0x6]] }
  0xac   :  { %536 = vrot.lane.b32.xlu1 %v534_v38, %s1720_s17  ;;  %368 = vrot.lane.b32.xlu0 %v366_v39, %s1720_s17  ;;  %v2020_v38 = vld [vmem:[#allocation3] sm:$0x3f]  ;;  %v1343_v39 = vstv %s1990_s28  ;;  %s1594_s28 = sld [smem:[#allocation8 + $0x36]] }
  0xb0   :  { %1010 = vrot.lane.b32.xlu1 %v1008_v45, %s1718_s7  ;;  %693 = vrot.lane.b32.xlu0 %v691_v46, %s1717_s6  ;;  %v1185_v45 = vstv %s1995_s29  ;;  %v433_v46 = vmul.f32 %v432_v32, %v1796_v10  ;;  %s1723_s29 = smov 50  }
  0xb1   :  { %v1186_v10 = vmul.f32 %v1185_v45, %v1979_v1  ;;  %v1353_v45 = vstv %s2047_s13 }
  0xb4   :  { %852 = vrot.lane.b32.xlu1 %v850_v50, %s1719_s10  ;;  %1331 = vrot.lane.b32.xlu0 %v1329_v52, %s1722_s3  ;;  %v768_v50 = vstv %s1997_s30  ;;  %v721_v52 = vstv %s1999_s4  ;;  %s1724_s30 = smov 51   ;;  %s2268_s4 = sld [smem:[#allocation8 + $0x37]] }
  0xb8   :  { %546 = vrot.lane.b32.xlu1 %v544_v55, %s1721_s25  ;;  %378 = vrot.lane.b32.xlu0 %v376_v56, %s1721_s25  ;;  %v1344_v56 = vmul.f32 %v1343_v39, %v2020_v38 }
  0xba   :  { %v1983_v3 = vpop.permute.xlu1 %287  ;;  %v266_v4 = vpop.permute.xlu0 %265 }
  0xbb   :  { %v267_v11 = vrot.slane %v266_v4, 2  ;;  %v289_v53 = vrot.slane %v1983_v3, 2 }
  0xbc   :  { %1020 = vrot.lane.b32.xlu1 %v1018_v61, %s1719_s10  ;;  %704 = vrot.lane.b32.xlu0 %v702_v62, %s1720_s17 }
  0xbd   :  { %v269_v23 = vsel %vm268_vm5, %v266_v4, %v267_v11  ;;  %v722_v11 = vmul.f32 %v721_v52, %v1965_v59  ;;  %v291_v13 = vsel %vm290_vm7, %v1983_v3, %v289_v53 }
  0xbe   :  { %v440_v15 = vpop.permute.xlu1 %439  ;;  %v277_v16 = vpop.permute.xlu0 %276  ;;  %v271_v35 = vadd.f32 %v269_v23, %v259_v17  ;;  %v2061_v23 = vld [vmem:[#allocation3 + $0x2] sm:$0x3f] }
  0xbf   :  { %v278_v24 = vrot.slane %v277_v16, 2  ;;  %v441_v43 = vrot.slane %v440_v15, 2 }
  0xc0   :  { %863 = vrot.lane.b32.xlu1 %v861_v5, %s1717_s6  ;;  %1178 = vrot.lane.b32.xlu0 %v1176_v7, %s1718_s7  ;;  %v769_v7 = vmul.f32 %v768_v50, %v1832_v41  ;;  %v1196_v41 = vstv %s2023_s8  ;;  %s1726_s8 = smov 47  }
  0xc1   :  { %v280_v22 = vsel %vm279_vm6, %v277_v16, %v278_v24  ;;  %v442_v61 = vsel %vm268_vm5, %v440_v15, %v441_v43  ;;  %v1038_v24 = vstv %s2028_s9  ;;  %s1727_s9 = smov 46  }
  0xc2   :  { %v608_v9 = vpop.permute.xlu1 %607  ;;  %v450_v30 = vpop.permute.xlu0 %449  ;;  %v282_v57 = vadd.f32 %v280_v22, %v271_v35  ;;  %v444_v17 = vadd.f32 %v442_v61, %v433_v46  ;;  %v937_v35 = vstv %s2035_s11  ;;  %v1039_v39 = vmul.f32 %v1038_v24, %v2008_v25  ;;  %s1728_s11 = smov 45  }
  0xc3   :  { %v609_v34 = vrot.slane %v608_v9, 2  ;;  %v451_v54 = vrot.slane %v450_v30, 2  ;;  %v938_v50 = vmul.f32 %v937_v35, %v1852_v58  ;;  %v1048_v61 = vstv %s2066_s15 }
  0xc4   :  { %556 = vrot.lane.b32.xlu1 %v554_v19, %s1722_s3  ;;  %388 = vrot.lane.b32.xlu0 %v386_v20, %s1722_s3  ;;  %v293_v18 = vadd.f32 %v291_v13, %v282_v57  ;;  %v872_v19 = vmul.f32 %v871_v2, %v2044_v0 }
  0xc5   :  { %v610_v44 = vsel %vm268_vm5, %v608_v9, %v609_v34  ;;  %v452_v14 = vsel %vm279_vm6, %v450_v30, %v451_v54 }
  0xc6   :  { %v618_v47 = vpop.permute.xlu1 %617  ;;  %v460_v48 = vpop.permute.xlu0 %459  ;;  %v612_v60 = vadd.f32 %v610_v44, %v601_v33  ;;  %v454_v26 = vadd.f32 %v452_v14, %v444_v17  ;;  %v881_v44 = vstv %s2040_s12 }
  0xc7   :  { %v619_v55 = vrot.slane %v618_v47, 2  ;;  %v461_v63 = vrot.slane %v460_v48, 2 }
  0xc8   :  { %1031 = vrot.lane.b32.xlu1 %v1029_v36, %s1717_s6  ;;  %714 = vrot.lane.b32.xlu0 %v712_v37, %s1721_s25  ;;  %v1197_v37 = vmul.f32 %v1196_v41, %v2061_v23 }
  0xc9   :  { %v620_v62 = vsel %vm279_vm6, %v618_v47, %v619_v55  ;;  %v462_v20 = vsel %vm290_vm7, %v460_v48, %v461_v63  ;;  %v882_v55 = vmul.f32 %v881_v44, %v2044_v0  ;;  %v1226_v44 = vstv %s2100_s21 }
  0xca   :  { %v622_v4 = vadd.f32 %v620_v62, %v612_v60  ;;  %v300_v5 = vpop.permute.xlu1 %299  ;;  %v776_v8 = vpop.permute.xlu0 %775  ;;  %v464_v36 = vadd.f32 %v462_v20, %v454_v26 }
  0xcb   :  { %v301_v15 = vrot.slane %v300_v5, 6  ;;  %v777_v16 = vrot.slane %v776_v8, 2 }
  0xcc   :  { %1346 = vrot.lane.b32.xlu1 %v1344_v56, %s1718_s7  ;;  %1188 = vrot.lane.b32.xlu0 %v1186_v10, %s1719_s10  ;;  %s2077_s7 = sld [smem:[#allocation8 + $0x5e]]  ;;  %v1354_v56 = vmul.f32 %v1353_v45, %v2020_v38  ;;  %v1206_v10 = vstv %s2064_s14  ;;  %v1374_v45 = vstv %s2102_s23 }
  0xcd   :  { %v303_v59 = vsel %vm302_vm8, %v301_v15, %v300_v5  ;;  %v778_v3 = vsel %vm268_vm5, %v776_v8, %v777_v16  ;;  %v1049_v8 = vmul.f32 %v1048_v61, %v2008_v25  ;;  %v2107_v15 = vld [vmem:[#allocation3 + $0x2] sm:$0x3f]  ;;  %v1364_v16 = vstv %s2079_s16 }
  0xce   :  { %v305_v29 = vadd.f32 %v303_v59, %v293_v18  ;;  %v780_v9 = vadd.f32 %v778_v3, %v769_v7  ;;  %v628_v30 = vpop.permute.xlu1 %627  ;;  %v471_v32 = vpop.permute.xlu0 %470  ;;  %v1207_v7 = vmul.f32 %v1206_v10, %v2061_v23  ;;  %v1105_v3 = vstv %s2082_s18 }
  0xcf   :  { %v629_v33 = vrot.slane %v628_v30, 2  ;;  %v472_v34 = vrot.slane %v471_v32, 6  ;;  %v1365_v26 = vmul.f32 %v1364_v16, %v2107_v15 }
  0xd0   :  { %724 = vrot.lane.b32.xlu1 %v722_v11, %s1722_s3  ;;  %874 = vrot.lane.b32.xlu0 %v872_v19, %s1720_s17 }
  0xd1   :  { %v630_v43 = vsel %vm290_vm7, %v628_v30, %v629_v33  ;;  %v473_v22 = vsel %vm302_vm8, %v472_v34, %v471_v32  ;;  %v1058_v32 = vstv %s2094_s20 }
  0xd2   :  { %v632_v46 = vadd.f32 %v630_v43, %v622_v4  ;;  %v475_v47 = vadd.f32 %v473_v22, %v464_v36  ;;  %v786_v48 = vpop.permute.xlu1 %785  ;;  %v945_v52 = vpop.permute.xlu0 %944  ;;  %v891_v14 = vstv %s2077_s7  ;;  %v1059_v22 = vmul.f32 %v1058_v32, %v2008_v25 }
  0xd3   :  { %v787_v53 = vrot.slane %v786_v48, 2  ;;  %v946_v54 = vrot.slane %v945_v52, 2  ;;  %v892_v24 = vmul.f32 %v891_v14, %v2044_v0  ;;  %v1106_v0 = vmul.f32 %v1105_v3, %v1866_v12 }
  0xd4   :  { %1199 = vrot.lane.b32.xlu1 %v1197_v37, %s1717_s6  ;;  %1041 = vrot.lane.b32.xlu0 %v1039_v39, %s1720_s17  ;;  %v1375_v25 = vmul.f32 %v1374_v45, %v2107_v15 }
  0xd5   :  { %v788_v57 = vsel %vm279_vm6, %v786_v48, %v787_v53  ;;  %v947_v60 = vsel %vm268_vm5, %v945_v52, %v946_v54 }
  0xd6   :  { %v790_v58 = vadd.f32 %v788_v57, %v780_v9  ;;  %v949_v62 = vadd.f32 %v947_v60, %v938_v50  ;;  %v481_v63 = vpop.permute.xlu1 %480  ;;  %v311_v2 = vpop.permute.xlu0 %310  ;;  %v1227_v57 = vmul.f32 %v1226_v44, %v2061_v23  ;;  %v1384_v60 = vstv %s2119_s26 }
  0xd7   :  { %v482_v4 = vrot.slane %v481_v63, 6  ;;  %v312_v5 = vrot.slane %v311_v2, 6 }
  0xd8   :  { %884 = vrot.lane.b32.xlu1 %v882_v55, %s1721_s25  ;;  %1356 = vrot.lane.b32.xlu0 %v1354_v56, %s1719_s10  ;;  %s2112_s10 = sld [smem:[#allocation8 + $0x31]] }
  0xd9   :  { %v483_v11 = vsel %vm313_vm9, %v482_v4, %v481_v63  ;;  %v314_v13 = vsel %vm313_vm9, %v312_v5, %v311_v2  ;;  %v1394_v63 = vstv %s2125_s0 }
  0xda   :  { %v485_v17 = vadd.f32 %v483_v11, %v475_v47  ;;  %v316_v18 = vadd.f32 %v314_v13, %v305_v29  ;;  %v955_v19 = vpop.permute.xlu1 %954  ;;  %v639_v41 = vpop.permute.xlu0 %638  ;;  %v1216_v29 = vstv %s2092_s19  ;;  %v498_v47 = vstv %s2110_s24 }
  0xdb   :  { %v956_v20 = vrot.slane %v955_v19, 2  ;;  %v640_v59 = vrot.slane %v639_v41, 6  ;;  %v1217_v43 = vmul.f32 %v1216_v29, %v2061_v23  ;;  %v499_v10 = vmul.f32 %v498_v47, %v1896_v49 }
  0xdc   :  { %1209 = vrot.lane.b32.xlu1 %v1207_v7, %s1720_s17  ;;  %1051 = vrot.lane.b32.xlu0 %v1049_v8, %s1721_s25  ;;  %v1273_v11 = vstv %s2128_s27  ;;  %v1385_v13 = vmul.f32 %v1384_v60, %v2107_v15  ;;  %v1395_v49 = vmul.f32 %v1394_v63, %v2107_v15 }
  0xdd   :  { %v957_v9 = vsel %vm279_vm6, %v955_v19, %v956_v20  ;;  %v641_v30 = vsel %vm302_vm8, %v640_v59, %v639_v41  ;;  %v1274_v41 = vmul.f32 %v1273_v11, %v1879_v27 }
  0xde   :  { %v959_v33 = vadd.f32 %v957_v9, %v949_v62  ;;  %v643_v34 = vadd.f32 %v641_v30, %v632_v46  ;;  %v797_v35 = vpop.permute.xlu1 %796  ;;  %v1113_v36 = vpop.permute.xlu0 %1112  ;;  %v330_v48 = vstv %s2112_s10 }
  0xdf   :  { %v798_v37 = vrot.slane %v797_v35, 6  ;;  %v1114_v39 = vrot.slane %v1113_v36, 2  ;;  %v331_v61 = vmul.f32 %v330_v48, %v1898_v51 }
  0xe0   :  { %894 = vrot.lane.b32.xlu1 %v892_v24, %s1722_s3  ;;  %1367 = vrot.lane.b32.xlu0 %v1365_v26, %s1717_s6  ;;  %s2150_s6 = sld [smem:[#allocation8 + $0x33]] }
  0xe1   :  { %v799_v46 = vsel %vm290_vm7, %v798_v37, %v797_v35  ;;  %v1115_v12 = vsel %vm268_vm5, %v1113_v36, %v1114_v39 }
  0xe2   :  { %v801_v50 = vadd.f32 %v799_v46, %v790_v58  ;;  %v1117_v52 = vadd.f32 %v1115_v12, %v1106_v0  ;;  %v491_v53 = vpop.permute.xlu1 %490  ;;  %v322_v54 = vpop.permute.xlu0 %321 }
  0xe3   :  { %v492_v55 = vrot.slane %v491_v53, 6  ;;  %v323_v56 = vrot.slane %v322_v54, 6 }
  0xe4   :  { %1219 = vrot.lane.b32.xlu1 %v1217_v43, %s1721_s25  ;;  %1061 = vrot.lane.b32.xlu0 %v1059_v22, %s1722_s3 }
  0xe5   :  { %v493_v58 = vsel %vm324_vm10, %v492_v55, %v491_v53  ;;  %v325_v62 = vsel %vm324_vm10, %v323_v56, %v322_v54 }
  0xe6   :  { %v495_v23 = vadd.f32 %v493_v58, %v485_v17  ;;  %v327_v2 = vadd.f32 %v325_v62, %v316_v18  ;;  %v966_v4 = vpop.permute.xlu1 %965  ;;  %v649_v5 = vpop.permute.xlu0 %648  ;;  %v666_v9 = vstv %s2150_s6 }
  0xe7   :  { %v967_v7 = vrot.slane %v966_v4, 6  ;;  %v650_v8 = vrot.slane %v649_v5, 6  ;;  %v667_v27 = vmul.f32 %v666_v9, %v1917_v6 }
  0xe8   :  { %1229 = vrot.lane.b32.xlu1 %v1227_v57, %s1722_s3  ;;  %1377 = vrot.lane.b32.xlu0 %v1375_v25, %s1720_s17  ;;  %v2157_v51 = vadd.f32 %v499_v10, %v495_v23  ;;  %v2159_v14 = vadd.f32 %v331_v61, %v327_v2  ;;  %s1566_s17 = sld [smem:[#allocation8 + $0x34]] }
  0xe9   :  { %v968_v16 = vsel %vm290_vm7, %v967_v7, %v966_v4  ;;  %v651_v17 = vsel %vm313_vm9, %v650_v8, %v649_v5 }
  0xea   :  { %v970_v18 = vadd.f32 %v968_v16, %v959_v33  ;;  %v653_v19 = vadd.f32 %v651_v17, %v643_v34  ;;  %v1281_v20 = vpop.permute.xlu1 %1280  ;;  %v1123_v59 = vpop.permute.xlu0 %1122 }
  0xeb   :  { %v1282_v3 = vrot.slane %v1281_v20, 2  ;;  %v1124_v24 = vrot.slane %v1123_v59, 2 }
  0xec   :  { %1387 = vrot.lane.b32.xlu0 %v1385_v13, %s1721_s25  ;;  %1397 = vrot.lane.b32.xlu1 %v1395_v49, %s1722_s3  ;;  %s1580_s3 = sld [smem:[#allocation8 + $0x35]] }
  0xed   :  { %v1283_v15 = vsel %vm268_vm5, %v1281_v20, %v1282_v3  ;;  %v1125_v26 = vsel %vm279_vm6, %v1123_v59, %v1124_v24 }
  0xee   :  { %v1285_v30 = vadd.f32 %v1283_v15, %v1274_v41  ;;  %v1127_v29 = vadd.f32 %v1125_v26, %v1117_v52  ;;  %v659_v32 = vpop.permute.xlu1 %658  ;;  %v808_v33 = vpop.permute.xlu0 %807  ;;  %v835_v4 = vstv %s1566_s17 }
  0xef   :  { %v660_v34 = vrot.slane %v659_v32, 6  ;;  %v809_v35 = vrot.slane %v808_v33, 6  ;;  %v836_v16 = vmul.f32 %v835_v4, %v1935_v28 }
  0xf1   :  { %v661_v0 = vsel %vm324_vm10, %v660_v34, %v659_v32  ;;  %v810_v36 = vsel %vm302_vm8, %v809_v35, %v808_v33 }
  0xf2   :  { %v663_v37 = vadd.f32 %v661_v0, %v653_v19  ;;  %v812_v39 = vadd.f32 %v810_v36, %v801_v50  ;;  %v1134_v43 = vpop.permute.xlu1 %1133  ;;  %v976_v22 = vpop.permute.xlu0 %975  ;;  %v1003_v24 = vstv %s1580_s3 }
  0xf3   :  { %v1135_v44 = vrot.slane %v1134_v43, 6  ;;  %v977_v45 = vrot.slane %v976_v22, 6 }
  0xf4   :  { %v2172_v46 = vadd.f32 %v667_v27, %v663_v37 }
  0xf5   :  { %v1136_v12 = vsel %vm290_vm7, %v1135_v44, %v1134_v43  ;;  %v978_v47 = vsel %vm302_vm8, %v977_v45, %v976_v22 }
  0xf6   :  { %v1138_v48 = vadd.f32 %v1136_v12, %v1127_v29  ;;  %v980_v52 = vadd.f32 %v978_v47, %v970_v18  ;;  %v818_v53 = vpop.permute.xlu1 %817  ;;  %v1291_v6 = vpop.permute.xlu0 %1290 }
  0xf7   :  { %v819_v54 = vrot.slane %v818_v53, 6  ;;  %v1292_v55 = vrot.slane %v1291_v6, 2 }
  0xf9   :  { %v820_v56 = vsel %vm313_vm9, %v819_v54, %v818_v53  ;;  %v1293_v50 = vsel %vm279_vm6, %v1291_v6, %v1292_v55 }
  0xfa   :  { %v822_v57 = vadd.f32 %v820_v56, %v812_v39  ;;  %v1295_v25 = vadd.f32 %v1293_v50, %v1285_v30  ;;  %v2178_v60 = vpop.permute.xlu1 %505  ;;  %v2180_v10 = vpop.permute.xlu0 %337  ;;  %v1004_v30 = vmul.f32 %v1003_v24, %v1949_v40  ;;  %v1171_v40 = vstv %s1594_s28 }
  0xfb   :  { %v1172_v47 = vmul.f32 %v1171_v40, %v1979_v1  ;;  %v507_v1 = vrot.slane %v2178_v60, 2 }
  0xfd   :  { %v508_v4 = vsel %vm268_vm5, %v2178_v60, %v507_v1 }
  0xfe   :  { %v1144_v61 = vpop.permute.xlu1 %1143  ;;  %v986_v58 = vpop.permute.xlu0 %985 }
  0xff   :  { %v1145_v62 = vrot.slane %v1144_v61, 6  ;;  %v987_v63 = vrot.slane %v986_v58, 6 }
 0x101   :  { %v1146_v23 = vsel %vm302_vm8, %v1145_v62, %v1144_v61  ;;  %v988_v2 = vsel %vm313_vm9, %v987_v63, %v986_v58  ;;  %v339_v58 = vrot.slane %v2180_v10, 2 }
 0x102   :  { %v1148_v5 = vadd.f32 %v1146_v23, %v1138_v48  ;;  %v990_v7 = vadd.f32 %v988_v2, %v980_v52  ;;  %v828_v8 = vpop.permute.xlu1 %827  ;;  %v1302_v11 = vpop.permute.xlu0 %1301 }
 0x103   :  { %v829_v13 = vrot.slane %v828_v8, 6  ;;  %v1303_v49 = vrot.slane %v1302_v11, 6 }
 0x105   :  { %v830_v17 = vsel %vm324_vm10, %v829_v13, %v828_v8  ;;  %v1304_v18 = vsel %vm290_vm7, %v1303_v49, %v1302_v11 }
 0x106   :  { %v832_v19 = vadd.f32 %v830_v17, %v822_v57  ;;  %v1306_v41 = vadd.f32 %v1304_v18, %v1295_v25  ;;  %v516_v20 = vpop.permute.xlu1 %515  ;;  %v348_v59 = vpop.permute.xlu0 %347 }
 0x107   :  { %v517_v23 = vrot.slane %v516_v20, 2  ;;  %v349_v2 = vrot.slane %v348_v59, 2 }
 0x108   :  { %v2187_v3 = vadd.f32 %v836_v16, %v832_v19  ;;  %v510_v19 = vadd.f32 %v508_v4, %v2157_v51 }
 0x109   :  { %v518_v49 = vsel %vm279_vm6, %v516_v20, %v517_v23  ;;  %v350_v16 = vsel %vm279_vm6, %v348_v59, %v349_v2 }
 0x10a   :  { %v996_v15 = vpop.permute.xlu1 %995  ;;  %v2189_v26 = vpop.permute.xlu0 %673 }
 0x10b   :  { %v997_v9 = vrot.slane %v996_v15, 6 }
 0x10d   :  { %v998_v29 = vsel %vm324_vm10, %v997_v9, %v996_v15  ;;  %v520_v9 = vadd.f32 %v518_v49, %v510_v19 }
 0x10e   :  { %v1000_v28 = vadd.f32 %v998_v29, %v990_v7  ;;  %v1312_v32 = vpop.permute.xlu1 %1311  ;;  %v1154_v33 = vpop.permute.xlu0 %1153 }
 0x10f   :  { %v1313_v34 = vrot.slane %v1312_v32, 6  ;;  %v1155_v35 = vrot.slane %v1154_v33, 6 }
 0x110   :  { %v2193_v27 = vadd.f32 %v1004_v30, %v1000_v28 }
 0x111   :  { %v1314_v0 = vsel %vm302_vm8, %v1313_v34, %v1312_v32  ;;  %v1156_v36 = vsel %vm313_vm9, %v1155_v35, %v1154_v33 }
 0x112   :  { %v2197_v37 = vadd.f32 %v1314_v0, %v1306_v41  ;;  %v1158_v39 = vadd.f32 %v1156_v36, %v1148_v5  ;;  %v526_v43 = vpop.permute.xlu1 %525  ;;  %v358_v22 = vpop.permute.xlu0 %357  ;;  %v340_v5 = vsel %vm268_vm5, %v2180_v10, %v339_v58 }
 0x113   :  { %v527_v7 = vrot.slane %v526_v43, 2  ;;  %v359_v8 = vrot.slane %v358_v22, 2  ;;  %v342_v41 = vadd.f32 %v340_v5, %v2159_v14  ;;  %v675_v14 = vrot.slane %v2189_v26, 2 }
 0x115   :  { %v528_v60 = vsel %vm290_vm7, %v526_v43, %v527_v7  ;;  %v360_v24 = vsel %vm290_vm7, %v358_v22, %v359_v8  ;;  %v352_v30 = vadd.f32 %v350_v16, %v342_v41 }
 0x116   :  { %v1164_v44 = vpop.permute.xlu1 %1163  ;;  %v2199_v45 = vpop.permute.xlu0 %683  ;;  %v530_v32 = vadd.f32 %v528_v60, %v520_v9 }
 0x117   :  { %v1165_v12 = vrot.slane %v1164_v44, 6  ;;  %v362_v51 = vadd.f32 %v360_v24, %v352_v30  ;;  %v685_v43 = vrot.slane %v2199_v45, 2 }
 0x119   :  { %v1166_v48 = vsel %vm324_vm10, %v1165_v12, %v1164_v44 }
 0x11a   :  { %v1168_v52 = vadd.f32 %v1166_v48, %v1158_v39  ;;  %v2203_v53 = vpop.permute.xlu1 %842  ;;  %v2205_v6 = vpop.permute.xlu0 %1321 }
 0x11b   :  { %v844_v24 = vrot.slane %v2203_v53, 2 }
 0x11c   :  { %v2207_v54 = vadd.f32 %v1172_v47, %v1168_v52  ;;  %v676_v47 = vsel %vm268_vm5, %v2189_v26, %v675_v14 }
 0x11d   :  { %v678_v2 = vadd.f32 %v676_v47, %v2172_v46  ;;  %v845_v14 = vsel %vm268_vm5, %v2203_v53, %v844_v24 }
 0x11e   :  { %v537_v55 = vpop.permute.xlu1 %536  ;;  %v369_v56 = vpop.permute.xlu0 %368 }
 0x11f   :  { %v538_v17 = vrot.slane %v537_v55, 6  ;;  %v370_v18 = vrot.slane %v369_v56, 6 }
 0x121   :  { %v539_v20 = vsel %vm302_vm8, %v538_v17, %v537_v55  ;;  %v371_v59 = vsel %vm302_vm8, %v370_v18, %v369_v56 }
 0x122   :  { %v2209_v50 = vpop.permute.xlu1 %1010  ;;  %v694_v57 = vpop.permute.xlu0 %693  ;;  %v541_v35 = vadd.f32 %v539_v20, %v530_v32  ;;  %v373_v0 = vadd.f32 %v371_v59, %v362_v51 }
 0x123   :  { %v695_v48 = vrot.slane %v694_v57, 2  ;;  %v1012_v20 = vrot.slane %v2209_v50, 2 }
 0x125   :  { %v696_v5 = vsel %vm290_vm7, %v694_v57, %v695_v48 }
 0x126   :  { %v2211_v25 = vpop.permute.xlu1 %852  ;;  %v2213_v61 = vpop.permute.xlu0 %1331 }
 0x127   :  { %v854_v59 = vrot.slane %v2211_v25, 2 }
 0x129   :  { %v855_v53 = vsel %vm279_vm6, %v2211_v25, %v854_v59 }
 0x12a   :  { %v547_v62 = vpop.permute.xlu1 %546  ;;  %v379_v63 = vpop.permute.xlu0 %378 }
 0x12b   :  { %v548_v10 = vrot.slane %v547_v62, 6  ;;  %v380_v15 = vrot.slane %v379_v63, 6 }
 0x12d   :  { %v549_v33 = vsel %vm313_vm9, %v548_v10, %v547_v62  ;;  %v381_v34 = vsel %vm313_vm9, %v380_v15, %v379_v63  ;;  %v686_v63 = vsel %vm279_vm6, %v2199_v45, %v685_v43  ;;  %v1323_v15 = vrot.slane %v2205_v6, 6 }
 0x12e   :  { %v2221_v11 = vpop.permute.xlu1 %1020  ;;  %v705_v13 = vpop.permute.xlu0 %704  ;;  %v551_v44 = vadd.f32 %v549_v33, %v541_v35  ;;  %v383_v12 = vadd.f32 %v381_v34, %v373_v0  ;;  %v688_v8 = vadd.f32 %v686_v63, %v678_v2  ;;  %v1333_v35 = vrot.slane %v2213_v61, 6 }
 0x12f   :  { %v706_v23 = vrot.slane %v705_v13, 6  ;;  %v1324_v34 = vsel %vm313_vm9, %v1323_v15, %v2205_v6  ;;  %v1339_v0 = vstv %s2268_s4  ;;  %v1013_v43 = vsel %vm268_vm5, %v2209_v50, %v1012_v20 }
 0x130   :  { %v698_v16 = vadd.f32 %v696_v5, %v688_v8  ;;  %v847_v6 = vadd.f32 %v845_v14, %v2187_v3  ;;  %v1015_v25 = vadd.f32 %v1013_v43, %v2193_v27  ;;  %v1334_v3 = vsel %vm324_vm10, %v1333_v35, %v2213_v61 }
 0x131   :  { %v707_v46 = vsel %vm302_vm8, %v706_v23, %v705_v13 }
 0x132   :  { %v2229_v29 = vpop.permute.xlu1 %863  ;;  %v2231_v28 = vpop.permute.xlu0 %1178  ;;  %v709_v57 = vadd.f32 %v707_v46, %v698_v16 }
 0x133   :  { %v865_v33 = vrot.slane %v2229_v29, 6 }
 0x135   :  { %v866_v47 = vsel %vm290_vm7, %v865_v33, %v2229_v29 }
 0x136   :  { %v557_v36 = vpop.permute.xlu1 %556  ;;  %v389_v39 = vpop.permute.xlu0 %388 }
 0x137   :  { %v558_v22 = vrot.slane %v557_v36, 6  ;;  %v390_v40 = vrot.slane %v389_v39, 6 }
 0x139   :  { %v559_v52 = vsel %vm324_vm10, %v558_v22, %v557_v36  ;;  %v391_v55 = vsel %vm324_vm10, %v390_v40, %v389_v39  ;;  %v1022_v22 = vrot.slane %v2221_v11, 2 }
 0x13a   :  { %v2243_v56 = vadd.f32 %v559_v52, %v551_v44  ;;  %v393_v1 = vadd.f32 %v391_v55, %v383_v12  ;;  %v2245_v58 = vpop.permute.xlu1 %1031  ;;  %v715_v62 = vpop.permute.xlu0 %714  ;;  %v1180_v44 = vrot.slane %v2231_v28, 2  ;;  %v1340_v52 = vmul.f32 %v1339_v0, %v2020_v38 }
 0x13b   :  { %v716_v7 = vrot.slane %v715_v62, 6  ;;  %v1033_v48 = vrot.slane %v2245_v58, 6  ;;  %v1326_v55 = vadd.f32 %v1324_v34, %v2197_v37  ;;  %v1023_v29 = vsel %vm279_vm6, %v2221_v11, %v1022_v22 }
 0x13c   :  { %v2252_v26 = vrot.slane %v2243_v56, %v1772_v42  ;;  %v2255_v4 = vrot.slane %v393_v1, %v1772_v42  ;;  %v399_v32 = vcombine.high %v393_v1, %v393_v1  ;;  %v857_v1 = vadd.f32 %v855_v53, %v847_v6 }
 0x13d   :  { %v717_v17 = vsel %vm313_vm9, %v716_v7, %v715_v62  ;;  %v1181_v27 = vsel %vm268_vm5, %v2231_v28, %v1180_v44  ;;  %v1034_v7 = vsel %vm290_vm7, %v1033_v48, %v2245_v58  ;;  %v1336_v16 = vadd.f32 %v1334_v3, %v1326_v55 }
 0x13e   :  { %v2258_v49 = vpop.permute.xlu1 %1346  ;;  %583 = vrot.lane.b32.xlu1 %v2252_v26, %s1723_s29  ;;  %v2262_v45 = vpop.permute.xlu0 %1188  ;;  %415 = vrot.lane.b32.xlu0 %v2255_v4, %s1724_s30  ;;  %v719_v60 = vadd.f32 %v717_v17, %v709_v57  ;;  %v413_v12 = vrot.slane %v399_v32, %v1772_v42  ;;  %v868_v5 = vadd.f32 %v866_v47, %v857_v1 }
 0x13f   :  { %v1190_v23 = vrot.slane %v2262_v45, 2  ;;  %v582_v61 = vcombine.high %v2252_v26, %v2252_v26  ;;  %v1025_v17 = vadd.f32 %v1023_v29, %v1015_v25  ;;  %v1348_v57 = vrot.slane %v2258_v49, 2 }
 0x140   :  { %v1183_v24 = vadd.f32 %v1181_v27, %v2207_v54  ;;  %v1341_v53 = vadd.f32 %v1340_v52, %v1336_v16 }
 0x141   :  { %v1191_v28 = vsel %vm279_vm6, %v2262_v45, %v1190_v23  ;;  %v1349_v45 = vsel %vm268_vm5, %v2258_v49, %v1348_v57  ;;  %v414_v23 = vcombine.high %v2255_v4, %v2255_v4 }
 0x142   :  { %v725_v18 = vpop.permute.xlu1 %724  ;;  %v875_v19 = vpop.permute.xlu0 %874  ;;  %v1351_v47 = vadd.f32 %v1349_v45, %v1341_v53 }
 0x143   :  { %v726_v41 = vrot.slane %v725_v18, 6  ;;  %v876_v40 = vrot.slane %v875_v19, 6 }
 0x145   :  { %v727_v10 = vsel %vm324_vm10, %v726_v41, %v725_v18  ;;  %v877_v38 = vsel %vm302_vm8, %v876_v40, %v875_v19 }
 0x146   :  { %v729_v9 = vadd.f32 %v727_v10, %v719_v60  ;;  %v1200_v30 = vpop.permute.xlu1 %1199  ;;  %v1042_v13 = vpop.permute.xlu0 %1041  ;;  %v879_v18 = vadd.f32 %v877_v38, %v868_v5  ;;  %v1036_v10 = vadd.f32 %v1034_v7, %v1025_v17 }
 0x147   :  { %v1043_v2 = vrot.slane %v1042_v13, 6  ;;  %v1201_v8 = vrot.slane %v1200_v30, 6 }
 0x148   :  { %v2276_v51 = vrot.slane %v729_v9, %v1772_v42  ;;  %v735_v37 = vcombine.high %v729_v9, %v729_v9 }
 0x149   :  { %v1044_v26 = vsel %vm302_vm8, %v1043_v2, %v1042_v13  ;;  %v1202_v20 = vsel %vm290_vm7, %v1201_v8, %v1200_v30  ;;  %v1193_v13 = vadd.f32 %v1191_v28, %v1183_v24 }
 0x14a   :  { %v885_v36 = vpop.permute.xlu1 %884  ;;  %v2285_v39 = vpop.permute.xlu0 %1356  ;;  %751 = vrot.lane.b32.xlu0 %v2276_v51, %s1725_s5  ;;  %v749_v9 = vrot.slane %v735_v37, %v1772_v42  ;;  %v1046_v33 = vadd.f32 %v1044_v26, %v1036_v10  ;;  %v750_v28 = vcombine.high %v2276_v51, %v2276_v51 }
 0x14b   :  { %v886_v50 = vrot.slane %v885_v36, 6  ;;  %v1358_v59 = vrot.slane %v2285_v39, 2  ;;  %v1204_v22 = vadd.f32 %v1202_v20, %v1193_v13 }
 0x14d   :  { %v887_v46 = vsel %vm313_vm9, %v886_v50, %v885_v36  ;;  %v1359_v49 = vsel %vm279_vm6, %v2285_v39, %v1358_v59 }
 0x14e   :  { %v1210_v62 = vpop.permute.xlu1 %1209  ;;  %v1052_v63 = vpop.permute.xlu0 %1051  ;;  %419 = vrot.lane.b32.xlu0 %v413_v12, %s1724_s30  ;;  %v889_v15 = vadd.f32 %v887_v46, %v879_v18  ;;  %v1361_v39 = vadd.f32 %v1359_v49, %v1351_v47 }
 0x14f   :  { %v1053_v11 = vrot.slane %v1052_v63, 6  ;;  %v1211_v60 = vrot.slane %v1210_v62, 6 }
 0x151   :  { %v1054_v32 = vsel %vm313_vm9, %v1053_v11, %v1052_v63  ;;  %v1212_v0 = vsel %vm302_vm8, %v1211_v60, %v1210_v62  ;;  %v567_v63 = vcombine.high %v2243_v56, %v2243_v56 }
 0x152   :  { %v895_v19 = vpop.permute.xlu1 %894  ;;  %v1368_v41 = vpop.permute.xlu0 %1367  ;;  %585 = vrot.lane.b32.xlu0 %v582_v61, %s1723_s29  ;;  %v1056_v40 = vadd.f32 %v1054_v32, %v1046_v33  ;;  %v1214_v48 = vadd.f32 %v1212_v0, %v1204_v22  ;;  %v176_v0 = vand.u32 127, %v119_v21 }
 0x153   :  { %v896_v58 = vrot.slane %v895_v19, 6  ;;  %v1369_v36 = vrot.slane %v1368_v41, 6  ;;  %v581_v4 = vrot.slane %v567_v63, %v1772_v42 }
 0x155   :  { %v897_v14 = vsel %vm324_vm10, %v896_v58, %v895_v19  ;;  %v1370_v52 = vsel %vm290_vm7, %v1369_v36, %v1368_v41  ;;  %vm1262_vm7 = vcmask 375808  }
 0x156   :  { %v899_v34 = vadd.f32 %v897_v14, %v889_v15  ;;  %v1220_v35 = vpop.permute.xlu1 %1219  ;;  %v1062_v54 = vpop.permute.xlu0 %1061  ;;  %755 = vrot.lane.b32.xlu0 %v749_v9, %s1725_s5  ;;  %v1372_v5 = vadd.f32 %v1370_v52, %v1361_v39 }
 0x157   :  { %v1221_v30 = vrot.slane %v1220_v35, 6  ;;  %v1063_v43 = vrot.slane %v1062_v54, 6 }
 0x158   :  { %v912_v6 = vrot.slane %v899_v34, %v1772_v42  ;;  %v905_v41 = vcombine.high %v899_v34, %v899_v34 }
 0x159   :  { %v1222_v44 = vsel %vm313_vm9, %v1221_v30, %v1220_v35  ;;  %v1064_v12 = vsel %vm324_vm10, %v1063_v43, %v1062_v54  ;;  %v177_v30 = vadd.s32 128, %v176_v0 }
 0x15a   :  { %v1066_v50 = vadd.f32 %v1064_v12, %v1056_v40  ;;  %v1230_v55 = vpop.permute.xlu1 %1229  ;;  %921 = vrot.lane.b32.xlu1 %v912_v6, %s1721_s25  ;;  %v1378_v25 = vpop.permute.xlu0 %1377  ;;  %v920_v1 = vcombine.high %v912_v6, %v912_v6  ;;  %v1224_v29 = vadd.f32 %v1222_v44, %v1214_v48  ;;  %v919_v58 = vrot.slane %v905_v41, %v1772_v42 }
 0x15b   :  { %v1231_v3 = vrot.slane %v1230_v55, 6  ;;  %v1379_v62 = vrot.slane %v1378_v25, 6  ;;  %v189_v22 = vand.u32 15, %v177_v30 }
 0x15c   :  { %923 = vrot.lane.b32.xlu0 %v920_v1, %s1721_s25  ;;  %v1072_v27 = vcombine.high %v1066_v50, %v1066_v50  ;;  %v1079_v56 = vrot.slane %v1066_v50, %v1772_v42 }
 0x15d   :  { %v1232_v38 = vsel %vm324_vm10, %v1231_v3, %v1230_v55  ;;  %v1380_v2 = vsel %vm302_vm8, %v1379_v62, %v1378_v25  ;;  %v211_v44 = vadd.s32 4294967294, %v189_v22  ;;  %v203_v12 = vadd.s32 4294967293, %v189_v22 }
 0x15e   :  { %v1234_v37 = vadd.f32 %v1232_v38, %v1224_v29  ;;  %v1388_v61 = vpop.permute.xlu0 %1387  ;;  %417 = vrot.lane.b32.xlu1 %v414_v23, %s1724_s30  ;;  %v1398_v7 = vpop.permute.xlu1 %1397  ;;  %v1382_v11 = vadd.f32 %v1380_v2, %v1372_v5  ;;  %v1086_v17 = vrot.slane %v1072_v27, %v1772_v42  ;;  %v1087_v15 = vcombine.high %v1079_v56, %v1079_v56 }
 0x15f   :  { %v1389_v8 = vrot.slane %v1388_v61, 6  ;;  %v1399_v46 = vrot.slane %v1398_v7, 6  ;;  %v219_v50 = vadd.s32 4294967295, %v189_v22  ;;  %vm213_vm15 = vcmp.ge.s32.totalorder %v211_v44, 0 }
 0x160   :  { %1088 = vrot.lane.b32.xlu0 %v1079_v56, %s1726_s8  ;;  %v1247_v57 = vrot.slane %v1234_v37, %v1772_v42  ;;  %v1240_v51 = vcombine.high %v1234_v37, %v1234_v37  ;;  %vm205_vm1 = vcmp.ge.s32.totalorder %v203_v12, 0  ;;  %v233_v38 = vadd.s32 1, %v189_v22 }
 0x161   :  { %v1390_v16 = vsel %vm313_vm9, %v1389_v8, %v1388_v61  ;;  %v1400_v19 = vsel %vm324_vm10, %v1399_v46, %v1398_v7  ;;  %vm221_vm3 = vcmp.ge.s32.totalorder %v219_v50, 0  ;;  %v241_v46 = vadd.s32 2, %v189_v22 }
 0x162   :  { %v1392_v18 = vadd.f32 %v1390_v16, %v1382_v11  ;;  %587 = vrot.lane.b32.xlu1 %v581_v4, %s1723_s29  ;;  %v1255_v26 = vcombine.high %v1247_v57, %v1247_v57  ;;  %v1254_v20 = vrot.slane %v1240_v51, %v1772_v42  ;;  %vm237_vm6 = vcmp.lt.s32.totalorder %v233_v38, 16 }
 0x163   :  { %vm245_vm10 = vcmp.lt.s32.totalorder %v241_v46, 16  ;;  %v1729_v44 = vmov 1966171168  }
 0x164   :  { %1092 = vrot.lane.b32.xlu0 %v1086_v17, %s1726_s8  ;;  %v1402_v60 = vadd.f32 %v1400_v19, %v1392_v18  ;;  %v1455_v12 = vunpack.c.l.s4 %v1729_v44 }
 0x166   :  { %753 = vrot.lane.b32.xlu1 %v750_v28, %s1725_s5  ;;  %v1408_v24 = vcombine.high %v1402_v60, %v1402_v60  ;;  %v1415_v10 = vrot.slane %v1402_v60, %v1772_v42 }
 0x168   :  { %1258 = vrot.lane.b32.xlu0 %v1255_v26, %s1727_s9  ;;  %v1422_v9 = vrot.slane %v1408_v24, %v1772_v42  ;;  %v1423_v59 = vcombine.high %v1415_v10, %v1415_v10  ;;  %v182_v42 = vand.u32 15, %v176_v0  ;;  %v249_v26 = vadd.s32 3, %v189_v22 }
 0x16a   :  { %925 = vrot.lane.b32.xlu1 %v919_v58, %s1721_s25  ;;  %v210_v6 = vadd.s32 4294967294, %v182_v42  ;;  %v202_v49 = vadd.s32 4294967293, %v182_v42  ;;  %v218_v48 = vadd.s32 4294967295, %v182_v42  ;;  %v232_v23 = vadd.s32 1, %v182_v42  ;;  %s1730_s25 = smov [#allocation9]  }
 0x16b   :  { %v240_v5 = vadd.s32 2, %v182_v42  ;;  %v248_v28 = vadd.s32 3, %v182_v42  ;;  %s1505_s12 = sshll.u32 %s1730_s25, 4  ;;  %s1506_s12 = int_to_ptr.vmem [resolvable:$true] %s1505_s12 }
 0x16c   :  { %1424 = vrot.lane.b32.xlu0 %v1415_v10, %s1728_s11  ;;  %vm204_vm14 = vcmp.ge.s32.totalorder %v202_v49, 0  ;;  %vm212_vm0 = vcmp.ge.s32.totalorder %v210_v6, 0  ;;  %vm220_vm2 = vcmp.ge.s32.totalorder %v218_v48, 0  ;;  %vm236_vm5 = vcmp.lt.s32.totalorder %v232_v23, 16  ;;  %s1683_s13 = scalar_lea.vmem %s1506_s12, 256  ;;  %p1688_p0 = scmp.lt.s32.totalorder %s1506_s12, %s1506_s12 }
 0x16d   :  { %vm244_vm8 = vcmp.lt.s32.totalorder %v240_v5, 16  ;;  %p1684_p13 = scmp.ne.s32.totalorder %s1506_s12, %s1683_s13  ;;  %p1689_p1 = scmp.lt.s32.totalorder %s1683_s13, %s1683_s13 }
 0x16e   :  { %1090 = vrot.lane.b32.xlu1 %v1087_v15, %s1726_s8 }
 0x16f   :  { %p1690_p2 = por %p1689_p1, %p1688_p0 }
 0x170   :  { %1428 = vrot.lane.b32.xlu0 %v1422_v9, %s1728_s11 }
 0x171   :  { %p1691_p3 = pnand %p1690_p2, %p1684_p13 }
 0x172   :  { %1256 = vrot.lane.b32.xlu1 %v1247_v57, %s1727_s9 }
 0x176   :  { %1260 = vrot.lane.b32.xlu1 %v1254_v20, %s1727_s9 }
 0x17a   :  { %1426 = vrot.lane.b32.xlu1 %v1423_v59, %s1728_s11 }
 0x1b0   :  { %v416_v32 = vpop.permute.xlu0 %415  ;;  %v584_v33 = vpop.permute.xlu1 %583 }
 0x1bc   :  { %v752_v14 = vpop.permute.xlu0 %751 }
 0x1c0   :  { %v420_v45 = vpop.permute.xlu0 %419 }
 0x1c4   :  { %v586_v13 = vpop.permute.xlu0 %585 }
 0x1c5   :  { %v590_v1 = vsel %vm589_vm12, %v584_v33, %v586_v13 }
 0x1c6   :  { %v594_v27 = vsel %vm212_vm0, %v590_v1, 0.0  ;;  %v1478_v1 = vsub.s32 0, %v1769_v31 }
 0x1c8   :  { %v756_v34 = vpop.permute.xlu0 %755 }
 0x1cc   :  { %v2362_v35 = vpop.permute.xlu1 %921 }
 0x1ce   :  { %v2364_v54 = vpop.permute.xlu0 %923 }
 0x1cf   :  { %v927_v60 = vsel %vm313_vm9, %v2362_v35, %v2364_v54 }
 0x1d0   :  { %v418_v36 = vpop.permute.xlu1 %417 }
 0x1d1   :  { %v422_v21 = vsel %vm421_vm11, %v416_v32, %v418_v36  ;;  %v423_v52 = vsel %vm421_vm11, %v418_v36, %v420_v45  ;;  %vm1430_vm11 = vcmask 367616  }
 0x1d2   :  { %v1089_v43 = vpop.permute.xlu0 %1088  ;;  %v426_v63 = vsel %vm204_vm14, %v422_v21, 0.0  ;;  %v427_v37 = vsel %vm205_vm1, %v423_v52, 0.0  ;;  %v1482_v52 = vsub.s32 1, %v1769_v31 }
 0x1d3   :  { %v596_v56 = vadd.f32 %v594_v27, %v426_v63  ;;  %v1647_v27 = vld [vmem:[#allocation4] sm:$0xff] }
 0x1d4   :  { %v588_v53 = vpop.permute.xlu1 %587 }
 0x1d5   :  { %v591_v25 = vsel %vm589_vm12, %v586_v13, %v588_v53  ;;  %vm252_vm12 = vcmp.lt.s32.totalorder %v248_v28, 16 }
 0x1d6   :  { %v1093_v47 = vpop.permute.xlu0 %1092  ;;  %v595_v39 = vsel %vm213_vm15, %v591_v25, 0.0 }
 0x1d7   :  { %v597_v8 = vadd.f32 %v595_v39, %v427_v37 }
 0x1d8   :  { %v754_v40 = vpop.permute.xlu1 %753 }
 0x1d9   :  { %v758_v3 = vsel %vm757_vm13, %v752_v14, %v754_v40  ;;  %v759_v62 = vsel %vm757_vm13, %v754_v40, %v756_v34  ;;  %vm253_vm13 = vcmp.lt.s32.totalorder %v249_v26, 16 }
 0x1da   :  { %v1259_v29 = vpop.permute.xlu0 %1258  ;;  %v762_v61 = vsel %vm220_vm2, %v758_v3, 0.0  ;;  %v763_v7 = vsel %vm221_vm3, %v759_v62, 0.0 }
 0x1db   :  { %v764_v4 = vadd.f32 %v762_v61, %v596_v56  ;;  %v765_v16 = vadd.f32 %v763_v7, %v597_v8  ;;  %v1648_v61 = vld [vmem:[#allocation4 + $0x8] sm:$0xff] }
 0x1dc   :  { %v926_v55 = vpop.permute.xlu1 %925 }
 0x1dd   :  { %v928_v18 = vsel %vm313_vm9, %v2364_v54, %v926_v55  ;;  %v933_v9 = vadd.f32 %v927_v60, %v764_v4 }
 0x1de   :  { %v1425_v19 = vpop.permute.xlu0 %1424  ;;  %v934_v15 = vadd.f32 %v928_v18, %v765_v16 }
 0x1e0   :  { %v1091_v2 = vpop.permute.xlu1 %1090 }
 0x1e1   :  { %v1095_v17 = vsel %vm1094_vm4, %v1089_v43, %v1091_v2  ;;  %v1096_v57 = vsel %vm1094_vm4, %v1091_v2, %v1093_v47  ;;  %v1456_v47 = vunpack.c.0.s8 %v1455_v12 }
 0x1e2   :  { %v1099_v58 = vsel %vm236_vm5, %v1095_v17, 0.0  ;;  %v1100_v24 = vsel %vm237_vm6, %v1096_v57, 0.0  ;;  %v1429_v45 = vpop.permute.xlu0 %1428 }
 0x1e3   :  { %v1101_v32 = vadd.f32 %v1099_v58, %v933_v9  ;;  %v1102_v14 = vadd.f32 %v1100_v24, %v934_v15  ;;  %v1459_v50 = vsub.s32 %v1456_v47, %v1769_v31 }
 0x1e4   :  { %v1257_v11 = vpop.permute.xlu1 %1256 }
 0x1e5   :  { %v1263_v41 = vsel %vm1262_vm7, %v1257_v11, %v1259_v29 }
 0x1e6   :  { %v1267_v20 = vsel %vm244_vm8, %v1263_v41, 0.0 }
 0x1e7   :  { %v1269_v33 = vadd.f32 %v1267_v20, %v1101_v32 }
 0x1e8   :  { %v1261_v10 = vpop.permute.xlu1 %1260 }
 0x1e9   :  { %v1264_v51 = vsel %vm1262_vm7, %v1259_v29, %v1261_v10 }
 0x1ea   :  { %v1268_v59 = vsel %vm245_vm10, %v1264_v51, 0.0 }
 0x1eb   :  { %v1270_v34 = vadd.f32 %v1268_v59, %v1102_v14 }
 0x1ec   :  { %v1427_v13 = vpop.permute.xlu1 %1426 }
 0x1ed   :  { %v1431_v35 = vsel %vm1430_vm11, %v1425_v19, %v1427_v13  ;;  %v1432_v54 = vsel %vm1430_vm11, %v1427_v13, %v1429_v45 }
 0x1ee   :  { %v1435_v0 = vsel %vm252_vm12, %v1431_v35, 0.0  ;;  %v1436_v36 = vsel %vm253_vm13, %v1432_v54, 0.0 }
 0x1ef   :  { %v1437_v30 = vadd.f32 %v1435_v0, %v1269_v33  ;;  %v1438_v43 = vadd.f32 %v1436_v36, %v1270_v34 }
 0x1f1   :  { %v1615_v53 = vmul.f32 -1.442695, %v1437_v30  ;;  %v1616_v42 = vmul.f32 -1.442695, %v1438_v43 }
 0x1f3   :  { %1639 = vpow2.f32 %v1615_v53 }
 0x1f4   :  { %1641 = vpow2.f32 %v1616_v42 }
 0x1fd   :  { %v1640_v22 = vpop.eup %1639 }
 0x1fe   :  { %v1642_v40 = vpop.eup %1641  ;;  %v1445_v6 = vadd.f32 1.0, %v1640_v22 }
 0x1ff   :  { %v1446_v49 = vadd.f32 1.0, %v1642_v40 }
 0x200   :  { %1643 = vrcp.f32 %v1445_v6 }
 0x201   :  { %1645 = vrcp.f32 %v1446_v49 }
 0x20a   :  { %v1644_v48 = vpop.eup %1643 }
 0x20b   :  { %v1646_v55 = vpop.eup %1645 }
 0x20c   :  { %v1453_v21 = vcombine.low %v1644_v48, %v1646_v55 }
 0x20e   :  { %v1460_v25 = vrot.slane %v1453_v21, %v1459_v50 }
 0x210   :  { %v1461_v3 = vcombine.high %v1460_v25, %v1460_v25  ;;  %v1468_v62 = vrot.slane %v1460_v25, %v1459_v50 }
 0x212   :  { %v1475_v63 = vrot.slane %v1461_v3, %v1459_v50  ;;  %v1479_v39 = vrot.slane %v1468_v62, %v1478_v1  ;;  %v1483_v29 = vrot.slane %v1468_v62, %v1482_v52 }
 0x214   :  { %v1487_v23 = vrot.slane %v1475_v63, %v1478_v1  ;;  %v1491_v38 = vrot.slane %v1475_v63, %v1482_v52  ;;  %v1492_v2 = vcombine.low %v1479_v39, %v1483_v29 }
 0x216   :  { %v1493_v5 = vcombine.low %v1487_v23, %v1491_v38  ;;  %v1496_v37 = vmul.f32 %v1647_v27, %v1492_v2 }
 0x218   :  { %v1497_v7 = vmul.f32 %v1648_v61, %v1493_v5  ;;  %1498 = vst [vmem:[#allocation9] sm:$0xff] %v1496_v37 }
 0x21a   :  { %1499 = vst [vmem:[#allocation9 + $0x8] sm:$0xff] %v1497_v7 }
 0x21b   :  { %1694 = shalt.err (!%p1691_p3)
}
 0x21c   :  { %s1695_s7 = scalar_lea.hbm %s2404_s2, 256 }
 0x21d   :  { %p1696_p4 = scmp.ne.s32.totalorder %s2404_s2, %s1695_s7  ;;  %p1699_p5 = scmp.lt.u32.totalorder %s1695_s7, %s2404_s2 }
 0x21f   :  { %p1701_p6 = pnand %p1699_p5, %p1696_p4 }
 0x221   :  { %1704 = shalt.err (!%p1701_p6)
}
 0x222   :  { %1511 = dma.vmem_to_hbm [thread:$0]  %s1506_s12, 256, %s2404_s2, [#allocation6], %s1712_s1, %s1712_s1, %s1713_s22  }
 0x223   :  { %1709 = dma.done.wait [#allocation6], 256  }
 0x224   :  { %1710 = vsyncadd [#allocation6], 4294967040 }
 0x225   :  { %1515 = vsyncpa [#allocation5], 1 }
 0x226   :  { %1516 = vsyncpa [#allocation6], 1 }
 0x227   :  { %1517 = vsyncpa [#allocation7], 1 }

</bundles_post_ra>
